<compile_context>
chip_gen: v7x
topology: tpu7x:2x2x1
jax: 0.10.0
libtpu: 0.0.40
codegen_flags: <defaults>
</compile_context>

<pallas_src>
import math
from functools import partial

import jax
import jax.numpy as jnp
from jax.experimental import pallas as pl
from jax.experimental.pallas import tpu as pltpu

# ----------------------------- config ---------------------------------------
VOCAB = 128
N_POS = 16
D = 32            # hidden size
H = 2             # heads
DH = D // H       # head dim
LAYERS = 2
LN_EPS = 1e-5
NEG_INF = -1e9
SCALE = 1.0 / math.sqrt(float(DH))        # python float -> no captured tracer
GELU_C = math.sqrt(2.0 / math.pi)         # python float -> no captured tracer

LAYER_KEYS = ("ln_1_g", "ln_1_b", "c_attn_w", "c_attn_b", "attn_proj_w",
              "attn_proj_b", "ln_2_g", "ln_2_b", "c_fc_w", "c_fc_b",
              "mlp_proj_w", "mlp_proj_b")
P_PER_LAYER = len(LAYER_KEYS)


# ----------------------------- in-kernel helpers -----------------------------
def _layernorm(v, g, b):
    # f32 vector math (v5e has no bf16 VPU/EUP)
    mu = jnp.mean(v, axis=-1, keepdims=True)
    var = jnp.mean(jnp.square(v - mu), axis=-1, keepdims=True)
    return (v - mu) * jax.lax.rsqrt(var + LN_EPS) * g + b


def _gelu_new(v):
    return 0.5 * v * (1.0 + jnp.tanh(GELU_C * (v + 0.044715 * v * v * v)))


def _bf16_dot(a, w, bias=None):
    # bf16 MXU operands, f32 accumulation
    y = jnp.dot(a.astype(jnp.bfloat16), w.astype(jnp.bfloat16),
                preferred_element_type=jnp.float32)
    if bias is not None:
        y = y + bias
    return y


# ----------------------------- fused kernel ----------------------------------
def _fused_reward_kernel(h_ref, mask_ref, *refs, batch, seq):
    """Whole backbone + pooling + reward head in one kernel (VMEM-resident)."""
    out_ref = refs[-1]
    prefs = refs[:-1]
    B, T = batch, seq

    x = h_ref[...].astype(jnp.float32)          # (B*T, D)
    m = mask_ref[...].astype(jnp.float32)       # (B, T)

    # causal additive mask built in-kernel (free VPU work, no HBM bias tensor)
    row = jax.lax.broadcasted_iota(jnp.int32, (T, T), 0)
    col = jax.lax.broadcasted_iota(jnp.int32, (T, T), 1)
    causal_neg = jnp.where(col <= row, 0.0, NEG_INF)            # (T, T) f32

    idx = 0
    for _ in range(LAYERS):
        (ln1_g, ln1_b, c_attn_w, c_attn_b, attn_pw, attn_pb,
         ln2_g, ln2_b, c_fc_w, c_fc_b, mlp_pw, mlp_pb) = (
            prefs[idx + j][...] for j in range(P_PER_LAYER))
        idx += P_PER_LAYER

        # --- attention block ---
        a_in = _layernorm(x, ln1_g, ln1_b)
        qkv = _bf16_dot(a_in, c_attn_w, c_attn_b)               # (B*T, 3D) f32
        q, k, v = qkv[:, :D], qkv[:, D:2 * D], qkv[:, 2 * D:]

        batch_rows = []
        for b in range(B):                                      # tiny; unrolled
            q_b = q[b * T:(b + 1) * T, :]                       # (T, D)
            k_b = k[b * T:(b + 1) * T, :]
            v_b = v[b * T:(b + 1) * T, :]
            bias_b = causal_neg + (1.0 - m[b:b + 1, :]) * NEG_INF   # (T, T)
            head_outs = []
            for hh in range(H):                                 # tiny; unrolled
                sl = slice(hh * DH, (hh + 1) * DH)
                q_bh = q_b[:, sl].astype(jnp.bfloat16)          # (T, DH)
                k_bh = k_b[:, sl].astype(jnp.bfloat16)
                v_bh = v_b[:, sl].astype(jnp.bfloat16)
                # q @ k^T via transposed contraction (no in-kernel transpose)
                s = jax.lax.dot_general(
                    q_bh, k_bh, (((1,), (1,)), ((), ())),
                    preferred_element_type=jnp.float32) * SCALE + bias_b
                s_max = jnp.max(s, axis=-1, keepdims=True)
                p = jnp.exp(s - s_max)
                denom = jnp.sum(p, axis=-1, keepdims=True)
                p = p * pl.reciprocal(denom, approx=True)       # EUP, not VALU
                head_outs.append(
                    jnp.dot(p.astype(jnp.bfloat16), v_bh,
                            preferred_element_type=jnp.float32))  # (T, DH)
            batch_rows.append(jnp.concatenate(head_outs, axis=-1))  # (T, D)
        attn = jnp.concatenate(batch_rows, axis=0)              # (B*T, D)

        x = x + _bf16_dot(attn, attn_pw, attn_pb)               # residual in-kernel

        # --- MLP block ---
        m_in = _layernorm(x, ln2_g, ln2_b)
        hid = _gelu_new(_bf16_dot(m_in, c_fc_w, c_fc_b))
        x = x + _bf16_dot(hid, mlp_pw, mlp_pb)                  # residual in-kernel

    ln_f_g = prefs[idx][...]
    ln_f_b = prefs[idx + 1][...]
    fc_w = prefs[idx + 2][...]
    fc_b = prefs[idx + 3][...]

    # pool hidden state of token 0 of each sequence, final LN, reward head
    pooled = jnp.concatenate([x[b * T:b * T + 1, :] for b in range(B)], axis=0)  # (B, D)
    pooled = _layernorm(pooled, ln_f_g, ln_f_b)
    reward = _bf16_dot(pooled, fc_w, fc_b)                      # (B, 1)
    out_ref[...] = reward.astype(out_ref.dtype)


# ----------------------------- parameters -----------------------------------
def init_params(key):
    ks = iter(jax.random.split(key, 3 + LAYERS * 4))

    def w(shape, dtype=jnp.bfloat16):
        # matmul weights stored bf16 (MXU-native); embeddings / head kept f32
        return (0.02 * jax.random.normal(next(ks), shape, dtype=jnp.float32)).astype(dtype)

    params = {
        "wte": w((VOCAB, D), jnp.float32),
        "wpe": w((N_POS, D), jnp.float32),
        "ln_f_g": jnp.ones((1, D), jnp.float32),
        "ln_f_b": jnp.zeros((1, D), jnp.float32),
        "fc_w": w((D, 1), jnp.float32),
        "fc_b": jnp.zeros((1, 1), jnp.float32),
        "layers": [],
    }
    for _ in range(LAYERS):
        params["layers"].append({
            "ln_1_g": jnp.ones((1, D), jnp.float32),
            "ln_1_b": jnp.zeros((1, D), jnp.float32),
            "c_attn_w": w((D, 3 * D)),
            "c_attn_b": jnp.zeros((1, 3 * D), jnp.float32),
            "attn_proj_w": w((D, D)),
            "attn_proj_b": jnp.zeros((1, D), jnp.float32),
            "ln_2_g": jnp.ones((1, D), jnp.float32),
            "ln_2_b": jnp.zeros((1, D), jnp.float32),
            "c_fc_w": w((D, 4 * D)),
            "c_fc_b": jnp.zeros((1, 4 * D), jnp.float32),
            "mlp_proj_w": w((4 * D, D)),
            "mlp_proj_b": jnp.zeros((1, D), jnp.float32),
        })
    return params


# ----------------------------- forward --------------------------------------
@jax.jit
def reward_model_forward(params, input_ids, attention_mask):
    """Equivalent of RewardModel.forward: backbone -> hidden[:, 0, :] -> fc -> (B, 1)."""
    B, T = input_ids.shape

    # TODO(synk): token/position embedding gather stays in XLA glue; a Pallas version
    # would need scalar-prefetch per-row DMA, which is not worth it at this scale.
    h = params["wte"][input_ids] + params["wpe"][jnp.arange(T)][None, :, :]
    h = h.astype(jnp.float32).reshape(B * T, D)
    mask_f = attention_mask.astype(jnp.float32)

    flat = []
    for lyr in params["layers"]:
        flat.extend(lyr[name] for name in LAYER_KEYS)
    flat.extend([params["ln_f_g"], params["ln_f_b"], params["fc_w"], params["fc_b"]])

    kernel = partial(_fused_reward_kernel, batch=B, seq=T)
    return pl.pallas_call(
        kernel,
        out_shape=jax.ShapeDtypeStruct((B, 1), jnp.float32),
        compiler_params=pltpu.CompilerParams(vmem_limit_bytes=32 * 1024 * 1024),
    )(h, mask_f, *flat)


# ----------------------------- main -----------------------------------------
if __name__ == "__main__":
    key = jax.random.PRNGKey(0)
    pkey, ikey = jax.random.split(key)

    params = init_params(pkey)

    B, T = 2, 8
    input_ids = jax.random.randint(ikey, (B, T), 0, VOCAB, dtype=jnp.int32)
    # second sequence has its last two positions padded out
    attention_mask = jnp.array([[1] * T, [1] * (T - 2) + [0] * 2], dtype=jnp.int32)

    reward = reward_model_forward(params, input_ids, attention_mask)
    reward = jax.block_until_ready(reward)

    assert reward.shape == (B, 1)
    assert bool(jnp.all(jnp.isfinite(reward)))
    print("KERNEL_OK")
</pallas_src>

<mosaic_0001>
module attributes {stable_mosaic.version = 11 : i64} {
  func.func @_fused_reward_kernel(%arg0: memref<16x32xf32, #tpu.memory_space<vmem>>, %arg1: memref<2x8xf32, #tpu.memory_space<vmem>>, %arg2: memref<1x32xf32, #tpu.memory_space<vmem>>, %arg3: memref<1x32xf32, #tpu.memory_space<vmem>>, %arg4: memref<32x96xbf16, #tpu.memory_space<vmem>>, %arg5: memref<1x96xf32, #tpu.memory_space<vmem>>, %arg6: memref<32x32xbf16, #tpu.memory_space<vmem>>, %arg7: memref<1x32xf32, #tpu.memory_space<vmem>>, %arg8: memref<1x32xf32, #tpu.memory_space<vmem>>, %arg9: memref<1x32xf32, #tpu.memory_space<vmem>>, %arg10: memref<32x128xbf16, #tpu.memory_space<vmem>>, %arg11: memref<1x128xf32, #tpu.memory_space<vmem>>, %arg12: memref<128x32xbf16, #tpu.memory_space<vmem>>, %arg13: memref<1x32xf32, #tpu.memory_space<vmem>>, %arg14: memref<1x32xf32, #tpu.memory_space<vmem>>, %arg15: memref<1x32xf32, #tpu.memory_space<vmem>>, %arg16: memref<32x96xbf16, #tpu.memory_space<vmem>>, %arg17: memref<1x96xf32, #tpu.memory_space<vmem>>, %arg18: memref<32x32xbf16, #tpu.memory_space<vmem>>, %arg19: memref<1x32xf32, #tpu.memory_space<vmem>>, %arg20: memref<1x32xf32, #tpu.memory_space<vmem>>, %arg21: memref<1x32xf32, #tpu.memory_space<vmem>>, %arg22: memref<32x128xbf16, #tpu.memory_space<vmem>>, %arg23: memref<1x128xf32, #tpu.memory_space<vmem>>, %arg24: memref<128x32xbf16, #tpu.memory_space<vmem>>, %arg25: memref<1x32xf32, #tpu.memory_space<vmem>>, %arg26: memref<1x32xf32, #tpu.memory_space<vmem>>, %arg27: memref<1x32xf32, #tpu.memory_space<vmem>>, %arg28: memref<32x1xf32, #tpu.memory_space<vmem>>, %arg29: memref<1x1xf32, #tpu.memory_space<vmem>>, %arg30: memref<2x1xf32, #tpu.memory_space<vmem>>) attributes {dimension_semantics = [], scalar_prefetch = 0 : i64, scratch_operands = 0 : i64, tpu.core_type = #tpu.core_type<tc>} {
    %c0 = arith.constant 0 : index
    %c0_0 = arith.constant 0 : index
    %0 = vector.load %arg0[%c0, %c0_0] : memref<16x32xf32, #tpu.memory_space<vmem>>, vector<16x32xf32>
    %c0_1 = arith.constant 0 : index
    %c0_2 = arith.constant 0 : index
    %1 = vector.load %arg1[%c0_1, %c0_2] : memref<2x8xf32, #tpu.memory_space<vmem>>, vector<2x8xf32>
    %2 = tpu.iota {dimensions = array<i32: 0>} : vector<8x8xi32>
    %3 = tpu.iota {dimensions = array<i32: 1>} : vector<8x8xi32>
    %4 = arith.cmpi sle, %3, %2 : vector<8x8xi32>
    %cst = arith.constant 0.000000e+00 : f32
    %cst_3 = arith.constant -1.000000e+09 : f32
    %5 = vector.broadcast %cst : f32 to vector<8x8xf32>
    %6 = vector.broadcast %cst_3 : f32 to vector<8x8xf32>
    %7 = arith.select %4, %5, %6 : vector<8x8xi1>, vector<8x8xf32>
    %c0_4 = arith.constant 0 : index
    %c0_5 = arith.constant 0 : index
    %8 = vector.load %arg2[%c0_4, %c0_5] : memref<1x32xf32, #tpu.memory_space<vmem>>, vector<1x32xf32>
    %c0_6 = arith.constant 0 : index
    %c0_7 = arith.constant 0 : index
    %9 = vector.load %arg3[%c0_6, %c0_7] : memref<1x32xf32, #tpu.memory_space<vmem>>, vector<1x32xf32>
    %c0_8 = arith.constant 0 : index
    %c0_9 = arith.constant 0 : index
    %10 = vector.load %arg4[%c0_8, %c0_9] : memref<32x96xbf16, #tpu.memory_space<vmem>>, vector<32x96xbf16>
    %c0_10 = arith.constant 0 : index
    %c0_11 = arith.constant 0 : index
    %11 = vector.load %arg5[%c0_10, %c0_11] : memref<1x96xf32, #tpu.memory_space<vmem>>, vector<1x96xf32>
    %c0_12 = arith.constant 0 : index
    %c0_13 = arith.constant 0 : index
    %12 = vector.load %arg6[%c0_12, %c0_13] : memref<32x32xbf16, #tpu.memory_space<vmem>>, vector<32x32xbf16>
    %c0_14 = arith.constant 0 : index
    %c0_15 = arith.constant 0 : index
    %13 = vector.load %arg7[%c0_14, %c0_15] : memref<1x32xf32, #tpu.memory_space<vmem>>, vector<1x32xf32>
    %c0_16 = arith.constant 0 : index
    %c0_17 = arith.constant 0 : index
    %14 = vector.load %arg8[%c0_16, %c0_17] : memref<1x32xf32, #tpu.memory_space<vmem>>, vector<1x32xf32>
    %c0_18 = arith.constant 0 : index
    %c0_19 = arith.constant 0 : index
    %15 = vector.load %arg9[%c0_18, %c0_19] : memref<1x32xf32, #tpu.memory_space<vmem>>, vector<1x32xf32>
    %c0_20 = arith.constant 0 : index
    %c0_21 = arith.constant 0 : index
    %16 = vector.load %arg10[%c0_20, %c0_21] : memref<32x128xbf16, #tpu.memory_space<vmem>>, vector<32x128xbf16>
    %c0_22 = arith.constant 0 : index
    %c0_23 = arith.constant 0 : index
    %17 = vector.load %arg11[%c0_22, %c0_23] : memref<1x128xf32, #tpu.memory_space<vmem>>, vector<1x128xf32>
    %c0_24 = arith.constant 0 : index
    %c0_25 = arith.constant 0 : index
    %18 = vector.load %arg12[%c0_24, %c0_25] : memref<128x32xbf16, #tpu.memory_space<vmem>>, vector<128x32xbf16>
    %c0_26 = arith.constant 0 : index
    %c0_27 = arith.constant 0 : index
    %19 = vector.load %arg13[%c0_26, %c0_27] : memref<1x32xf32, #tpu.memory_space<vmem>>, vector<1x32xf32>
    %cst_28 = arith.constant dense<0.000000e+00> : vector<16xf32>
    %20 = vector.multi_reduction <add>, %0, %cst_28 [1] : vector<16x32xf32> to vector<16xf32>
    %21 = vector.shape_cast %20 : vector<16xf32> to vector<16x1xf32>
    %cst_29 = arith.constant 3.200000e+01 : f32
    %22 = vector.broadcast %cst_29 : f32 to vector<16x1xf32>
    %23 = arith.divf %21, %22 : vector<16x1xf32>
    %24 = vector.broadcast %23 : vector<16x1xf32> to vector<16x32xf32>
    %25 = arith.subf %0, %24 : vector<16x32xf32>
    %26 = arith.mulf %25, %25 : vector<16x32xf32>
    %cst_30 = arith.constant dense<0.000000e+00> : vector<16xf32>
    %27 = vector.multi_reduction <add>, %26, %cst_30 [1] : vector<16x32xf32> to vector<16xf32>
    %28 = vector.shape_cast %27 : vector<16xf32> to vector<16x1xf32>
    %cst_31 = arith.constant 3.200000e+01 : f32
    %29 = vector.broadcast %cst_31 : f32 to vector<16x1xf32>
    %30 = arith.divf %28, %29 : vector<16x1xf32>
    %31 = vector.broadcast %23 : vector<16x1xf32> to vector<16x32xf32>
    %32 = arith.subf %0, %31 : vector<16x32xf32>
    %cst_32 = arith.constant 9.99999974E-6 : f32
    %33 = vector.broadcast %cst_32 : f32 to vector<16x1xf32>
    %34 = arith.addf %30, %33 : vector<16x1xf32>
    %35 = math.rsqrt %34 : vector<16x1xf32>
    %36 = vector.broadcast %35 : vector<16x1xf32> to vector<16x32xf32>
    %37 = arith.mulf %32, %36 : vector<16x32xf32>
    %38 = vector.broadcast %8 : vector<1x32xf32> to vector<16x32xf32>
    %39 = arith.mulf %37, %38 : vector<16x32xf32>
    %40 = vector.broadcast %9 : vector<1x32xf32> to vector<16x32xf32>
    %41 = arith.addf %39, %40 : vector<16x32xf32>
    %42 = arith.truncf %41 : vector<16x32xf32> to vector<16x32xbf16>
    %cst_33 = arith.constant dense<0.000000e+00> : vector<16x96xf32>
    %43 = tpu.matmul %42, %10, %cst_33 {dimension_numbers = #tpu.dot_dimension_numbers<[1], [0], [0], [1], [0, 0, 1, 1], [], []>} : vector<16x32xbf16>, vector<32x96xbf16>, vector<16x96xf32> -> vector<16x96xf32>
    %44 = vector.broadcast %11 : vector<1x96xf32> to vector<16x96xf32>
    %45 = arith.addf %43, %44 : vector<16x96xf32>
    %46 = vector.extract_strided_slice %45 {offsets = [0, 0], sizes = [16, 32], strides = [1, 1]} : vector<16x96xf32> to vector<16x32xf32>
    %47 = vector.extract_strided_slice %45 {offsets = [0, 32], sizes = [16, 32], strides = [1, 1]} : vector<16x96xf32> to vector<16x32xf32>
    %48 = vector.extract_strided_slice %45 {offsets = [0, 64], sizes = [16, 32], strides = [1, 1]} : vector<16x96xf32> to vector<16x32xf32>
    %49 = vector.extract_strided_slice %46 {offsets = [0, 0], sizes = [8, 32], strides = [1, 1]} : vector<16x32xf32> to vector<8x32xf32>
    %50 = vector.extract_strided_slice %47 {offsets = [0, 0], sizes = [8, 32], strides = [1, 1]} : vector<16x32xf32> to vector<8x32xf32>
    %51 = vector.extract_strided_slice %48 {offsets = [0, 0], sizes = [8, 32], strides = [1, 1]} : vector<16x32xf32> to vector<8x32xf32>
    %52 = vector.extract_strided_slice %1 {offsets = [0, 0], sizes = [1, 8], strides = [1, 1]} : vector<2x8xf32> to vector<1x8xf32>
    %cst_34 = arith.constant 1.000000e+00 : f32
    %53 = vector.broadcast %cst_34 : f32 to vector<1x8xf32>
    %54 = arith.subf %53, %52 : vector<1x8xf32>
    %cst_35 = arith.constant -1.000000e+09 : f32
    %55 = vector.broadcast %cst_35 : f32 to vector<1x8xf32>
    %56 = arith.mulf %54, %55 : vector<1x8xf32>
    %57 = vector.broadcast %56 : vector<1x8xf32> to vector<8x8xf32>
    %58 = arith.addf %7, %57 : vector<8x8xf32>
    %59 = vector.extract_strided_slice %49 {offsets = [0, 0], sizes = [8, 16], strides = [1, 1]} : vector<8x32xf32> to vector<8x16xf32>
    %60 = arith.truncf %59 : vector<8x16xf32> to vector<8x16xbf16>
    %61 = vector.extract_strided_slice %50 {offsets = [0, 0], sizes = [8, 16], strides = [1, 1]} : vector<8x32xf32> to vector<8x16xf32>
    %62 = arith.truncf %61 : vector<8x16xf32> to vector<8x16xbf16>
    %63 = vector.extract_strided_slice %51 {offsets = [0, 0], sizes = [8, 16], strides = [1, 1]} : vector<8x32xf32> to vector<8x16xf32>
    %64 = arith.truncf %63 : vector<8x16xf32> to vector<8x16xbf16>
    %cst_36 = arith.constant dense<0.000000e+00> : vector<8x8xf32>
    %65 = tpu.matmul %60, %62, %cst_36 {dimension_numbers = #tpu.dot_dimension_numbers<[1], [1], [0], [0], [0, 0, 1, 0], [], []>} : vector<8x16xbf16>, vector<8x16xbf16>, vector<8x8xf32> -> vector<8x8xf32>
    %cst_37 = arith.constant 2.500000e-01 : f32
    %66 = vector.broadcast %cst_37 : f32 to vector<8x8xf32>
    %67 = arith.mulf %65, %66 : vector<8x8xf32>
    %68 = arith.addf %67, %58 : vector<8x8xf32>
    %cst_38 = arith.constant dense<0xFF800000> : vector<8xf32>
    %69 = vector.multi_reduction <maximumf>, %68, %cst_38 [1] : vector<8x8xf32> to vector<8xf32>
    %70 = vector.shape_cast %69 : vector<8xf32> to vector<8x1xf32>
    %71 = vector.broadcast %70 : vector<8x1xf32> to vector<8x8xf32>
    %72 = arith.subf %68, %71 : vector<8x8xf32>
    %73 = math.exp %72 : vector<8x8xf32>
    %cst_39 = arith.constant dense<0.000000e+00> : vector<8xf32>
    %74 = vector.multi_reduction <add>, %73, %cst_39 [1] : vector<8x8xf32> to vector<8xf32>
    %75 = vector.shape_cast %74 : vector<8xf32> to vector<8x1xf32>
    %76 = tpu.reciprocal %75 {approx = true} : vector<8x1xf32> -> vector<8x1xf32>
    %77 = vector.broadcast %76 : vector<8x1xf32> to vector<8x8xf32>
    %78 = arith.mulf %73, %77 : vector<8x8xf32>
    %79 = arith.truncf %78 : vector<8x8xf32> to vector<8x8xbf16>
    %cst_40 = arith.constant dense<0.000000e+00> : vector<8x16xf32>
    %80 = tpu.matmul %79, %64, %cst_40 {dimension_numbers = #tpu.dot_dimension_numbers<[1], [0], [0], [1], [0, 0, 1, 1], [], []>} : vector<8x8xbf16>, vector<8x16xbf16>, vector<8x16xf32> -> vector<8x16xf32>
    %81 = vector.extract_strided_slice %49 {offsets = [0, 16], sizes = [8, 16], strides = [1, 1]} : vector<8x32xf32> to vector<8x16xf32>
    %82 = arith.truncf %81 : vector<8x16xf32> to vector<8x16xbf16>
    %83 = vector.extract_strided_slice %50 {offsets = [0, 16], sizes = [8, 16], strides = [1, 1]} : vector<8x32xf32> to vector<8x16xf32>
    %84 = arith.truncf %83 : vector<8x16xf32> to vector<8x16xbf16>
    %85 = vector.extract_strided_slice %51 {offsets = [0, 16], sizes = [8, 16], strides = [1, 1]} : vector<8x32xf32> to vector<8x16xf32>
    %86 = arith.truncf %85 : vector<8x16xf32> to vector<8x16xbf16>
    %cst_41 = arith.constant dense<0.000000e+00> : vector<8x8xf32>
    %87 = tpu.matmul %82, %84, %cst_41 {dimension_numbers = #tpu.dot_dimension_numbers<[1], [1], [0], [0], [0, 0, 1, 0], [], []>} : vector<8x16xbf16>, vector<8x16xbf16>, vector<8x8xf32> -> vector<8x8xf32>
    %cst_42 = arith.constant 2.500000e-01 : f32
    %88 = vector.broadcast %cst_42 : f32 to vector<8x8xf32>
    %89 = arith.mulf %87, %88 : vector<8x8xf32>
    %90 = arith.addf %89, %58 : vector<8x8xf32>
    %cst_43 = arith.constant dense<0xFF800000> : vector<8xf32>
    %91 = vector.multi_reduction <maximumf>, %90, %cst_43 [1] : vector<8x8xf32> to vector<8xf32>
    %92 = vector.shape_cast %91 : vector<8xf32> to vector<8x1xf32>
    %93 = vector.broadcast %92 : vector<8x1xf32> to vector<8x8xf32>
    %94 = arith.subf %90, %93 : vector<8x8xf32>
    %95 = math.exp %94 : vector<8x8xf32>
    %cst_44 = arith.constant dense<0.000000e+00> : vector<8xf32>
    %96 = vector.multi_reduction <add>, %95, %cst_44 [1] : vector<8x8xf32> to vector<8xf32>
    %97 = vector.shape_cast %96 : vector<8xf32> to vector<8x1xf32>
    %98 = tpu.reciprocal %97 {approx = true} : vector<8x1xf32> -> vector<8x1xf32>
    %99 = vector.broadcast %98 : vector<8x1xf32> to vector<8x8xf32>
    %100 = arith.mulf %95, %99 : vector<8x8xf32>
    %101 = arith.truncf %100 : vector<8x8xf32> to vector<8x8xbf16>
    %cst_45 = arith.constant dense<0.000000e+00> : vector<8x16xf32>
    %102 = tpu.matmul %101, %86, %cst_45 {dimension_numbers = #tpu.dot_dimension_numbers<[1], [0], [0], [1], [0, 0, 1, 1], [], []>} : vector<8x8xbf16>, vector<8x16xbf16>, vector<8x16xf32> -> vector<8x16xf32>
    %103 = tpu.concatenate %80, %102 in 1 : vector<8x16xf32>, vector<8x16xf32> -> vector<8x32xf32>
    %104 = vector.extract_strided_slice %46 {offsets = [8, 0], sizes = [8, 32], strides = [1, 1]} : vector<16x32xf32> to vector<8x32xf32>
    %105 = vector.extract_strided_slice %47 {offsets = [8, 0], sizes = [8, 32], strides = [1, 1]} : vector<16x32xf32> to vector<8x32xf32>
    %106 = vector.extract_strided_slice %48 {offsets = [8, 0], sizes = [8, 32], strides = [1, 1]} : vector<16x32xf32> to vector<8x32xf32>
    %107 = vector.extract_strided_slice %1 {offsets = [1, 0], sizes = [1, 8], strides = [1, 1]} : vector<2x8xf32> to vector<1x8xf32>
    %cst_46 = arith.constant 1.000000e+00 : f32
    %108 = vector.broadcast %cst_46 : f32 to vector<1x8xf32>
    %109 = arith.subf %108, %107 : vector<1x8xf32>
    %cst_47 = arith.constant -1.000000e+09 : f32
    %110 = vector.broadcast %cst_47 : f32 to vector<1x8xf32>
    %111 = arith.mulf %109, %110 : vector<1x8xf32>
    %112 = vector.broadcast %111 : vector<1x8xf32> to vector<8x8xf32>
    %113 = arith.addf %7, %112 : vector<8x8xf32>
    %114 = vector.extract_strided_slice %104 {offsets = [0, 0], sizes = [8, 16], strides = [1, 1]} : vector<8x32xf32> to vector<8x16xf32>
    %115 = arith.truncf %114 : vector<8x16xf32> to vector<8x16xbf16>
    %116 = vector.extract_strided_slice %105 {offsets = [0, 0], sizes = [8, 16], strides = [1, 1]} : vector<8x32xf32> to vector<8x16xf32>
    %117 = arith.truncf %116 : vector<8x16xf32> to vector<8x16xbf16>
    %118 = vector.extract_strided_slice %106 {offsets = [0, 0], sizes = [8, 16], strides = [1, 1]} : vector<8x32xf32> to vector<8x16xf32>
    %119 = arith.truncf %118 : vector<8x16xf32> to vector<8x16xbf16>
    %cst_48 = arith.constant dense<0.000000e+00> : vector<8x8xf32>
    %120 = tpu.matmul %115, %117, %cst_48 {dimension_numbers = #tpu.dot_dimension_numbers<[1], [1], [0], [0], [0, 0, 1, 0], [], []>} : vector<8x16xbf16>, vector<8x16xbf16>, vector<8x8xf32> -> vector<8x8xf32>
    %cst_49 = arith.constant 2.500000e-01 : f32
    %121 = vector.broadcast %cst_49 : f32 to vector<8x8xf32>
    %122 = arith.mulf %120, %121 : vector<8x8xf32>
    %123 = arith.addf %122, %113 : vector<8x8xf32>
    %cst_50 = arith.constant dense<0xFF800000> : vector<8xf32>
    %124 = vector.multi_reduction <maximumf>, %123, %cst_50 [1] : vector<8x8xf32> to vector<8xf32>
    %125 = vector.shape_cast %124 : vector<8xf32> to vector<8x1xf32>
    %126 = vector.broadcast %125 : vector<8x1xf32> to vector<8x8xf32>
    %127 = arith.subf %123, %126 : vector<8x8xf32>
    %128 = math.exp %127 : vector<8x8xf32>
    %cst_51 = arith.constant dense<0.000000e+00> : vector<8xf32>
    %129 = vector.multi_reduction <add>, %128, %cst_51 [1] : vector<8x8xf32> to vector<8xf32>
    %130 = vector.shape_cast %129 : vector<8xf32> to vector<8x1xf32>
    %131 = tpu.reciprocal %130 {approx = true} : vector<8x1xf32> -> vector<8x1xf32>
    %132 = vector.broadcast %131 : vector<8x1xf32> to vector<8x8xf32>
    %133 = arith.mulf %128, %132 : vector<8x8xf32>
    %134 = arith.truncf %133 : vector<8x8xf32> to vector<8x8xbf16>
    %cst_52 = arith.constant dense<0.000000e+00> : vector<8x16xf32>
    %135 = tpu.matmul %134, %119, %cst_52 {dimension_numbers = #tpu.dot_dimension_numbers<[1], [0], [0], [1], [0, 0, 1, 1], [], []>} : vector<8x8xbf16>, vector<8x16xbf16>, vector<8x16xf32> -> vector<8x16xf32>
    %136 = vector.extract_strided_slice %104 {offsets = [0, 16], sizes = [8, 16], strides = [1, 1]} : vector<8x32xf32> to vector<8x16xf32>
    %137 = arith.truncf %136 : vector<8x16xf32> to vector<8x16xbf16>
    %138 = vector.extract_strided_slice %105 {offsets = [0, 16], sizes = [8, 16], strides = [1, 1]} : vector<8x32xf32> to vector<8x16xf32>
    %139 = arith.truncf %138 : vector<8x16xf32> to vector<8x16xbf16>
    %140 = vector.extract_strided_slice %106 {offsets = [0, 16], sizes = [8, 16], strides = [1, 1]} : vector<8x32xf32> to vector<8x16xf32>
    %141 = arith.truncf %140 : vector<8x16xf32> to vector<8x16xbf16>
    %cst_53 = arith.constant dense<0.000000e+00> : vector<8x8xf32>
    %142 = tpu.matmul %137, %139, %cst_53 {dimension_numbers = #tpu.dot_dimension_numbers<[1], [1], [0], [0], [0, 0, 1, 0], [], []>} : vector<8x16xbf16>, vector<8x16xbf16>, vector<8x8xf32> -> vector<8x8xf32>
    %cst_54 = arith.constant 2.500000e-01 : f32
    %143 = vector.broadcast %cst_54 : f32 to vector<8x8xf32>
    %144 = arith.mulf %142, %143 : vector<8x8xf32>
    %145 = arith.addf %144, %113 : vector<8x8xf32>
    %cst_55 = arith.constant dense<0xFF800000> : vector<8xf32>
    %146 = vector.multi_reduction <maximumf>, %145, %cst_55 [1] : vector<8x8xf32> to vector<8xf32>
    %147 = vector.shape_cast %146 : vector<8xf32> to vector<8x1xf32>
    %148 = vector.broadcast %147 : vector<8x1xf32> to vector<8x8xf32>
    %149 = arith.subf %145, %148 : vector<8x8xf32>
    %150 = math.exp %149 : vector<8x8xf32>
    %cst_56 = arith.constant dense<0.000000e+00> : vector<8xf32>
    %151 = vector.multi_reduction <add>, %150, %cst_56 [1] : vector<8x8xf32> to vector<8xf32>
    %152 = vector.shape_cast %151 : vector<8xf32> to vector<8x1xf32>
    %153 = tpu.reciprocal %152 {approx = true} : vector<8x1xf32> -> vector<8x1xf32>
    %154 = vector.broadcast %153 : vector<8x1xf32> to vector<8x8xf32>
    %155 = arith.mulf %150, %154 : vector<8x8xf32>
    %156 = arith.truncf %155 : vector<8x8xf32> to vector<8x8xbf16>
    %cst_57 = arith.constant dense<0.000000e+00> : vector<8x16xf32>
    %157 = tpu.matmul %156, %141, %cst_57 {dimension_numbers = #tpu.dot_dimension_numbers<[1], [0], [0], [1], [0, 0, 1, 1], [], []>} : vector<8x8xbf16>, vector<8x16xbf16>, vector<8x16xf32> -> vector<8x16xf32>
    %158 = tpu.concatenate %135, %157 in 1 : vector<8x16xf32>, vector<8x16xf32> -> vector<8x32xf32>
    %159 = tpu.concatenate %103, %158 in 0 : vector<8x32xf32>, vector<8x32xf32> -> vector<16x32xf32>
    %160 = arith.truncf %159 : vector<16x32xf32> to vector<16x32xbf16>
    %cst_58 = arith.constant dense<0.000000e+00> : vector<16x32xf32>
    %161 = tpu.matmul %160, %12, %cst_58 {dimension_numbers = #tpu.dot_dimension_numbers<[1], [0], [0], [1], [0, 0, 1, 1], [], []>} : vector<16x32xbf16>, vector<32x32xbf16>, vector<16x32xf32> -> vector<16x32xf32>
    %162 = vector.broadcast %13 : vector<1x32xf32> to vector<16x32xf32>
    %163 = arith.addf %161, %162 : vector<16x32xf32>
    %164 = arith.addf %0, %163 : vector<16x32xf32>
    %cst_59 = arith.constant dense<0.000000e+00> : vector<16xf32>
    %165 = vector.multi_reduction <add>, %164, %cst_59 [1] : vector<16x32xf32> to vector<16xf32>
    %166 = vector.shape_cast %165 : vector<16xf32> to vector<16x1xf32>
    %cst_60 = arith.constant 3.200000e+01 : f32
    %167 = vector.broadcast %cst_60 : f32 to vector<16x1xf32>
    %168 = arith.divf %166, %167 : vector<16x1xf32>
    %169 = vector.broadcast %168 : vector<16x1xf32> to vector<16x32xf32>
    %170 = arith.subf %164, %169 : vector<16x32xf32>
    %171 = arith.mulf %170, %170 : vector<16x32xf32>
    %cst_61 = arith.constant dense<0.000000e+00> : vector<16xf32>
    %172 = vector.multi_reduction <add>, %171, %cst_61 [1] : vector<16x32xf32> to vector<16xf32>
    %173 = vector.shape_cast %172 : vector<16xf32> to vector<16x1xf32>
    %cst_62 = arith.constant 3.200000e+01 : f32
    %174 = vector.broadcast %cst_62 : f32 to vector<16x1xf32>
    %175 = arith.divf %173, %174 : vector<16x1xf32>
    %176 = vector.broadcast %168 : vector<16x1xf32> to vector<16x32xf32>
    %177 = arith.subf %164, %176 : vector<16x32xf32>
    %cst_63 = arith.constant 9.99999974E-6 : f32
    %178 = vector.broadcast %cst_63 : f32 to vector<16x1xf32>
    %179 = arith.addf %175, %178 : vector<16x1xf32>
    %180 = math.rsqrt %179 : vector<16x1xf32>
    %181 = vector.broadcast %180 : vector<16x1xf32> to vector<16x32xf32>
    %182 = arith.mulf %177, %181 : vector<16x32xf32>
    %183 = vector.broadcast %14 : vector<1x32xf32> to vector<16x32xf32>
    %184 = arith.mulf %182, %183 : vector<16x32xf32>
    %185 = vector.broadcast %15 : vector<1x32xf32> to vector<16x32xf32>
    %186 = arith.addf %184, %185 : vector<16x32xf32>
    %187 = arith.truncf %186 : vector<16x32xf32> to vector<16x32xbf16>
    %cst_64 = arith.constant dense<0.000000e+00> : vector<16x128xf32>
    %188 = tpu.matmul %187, %16, %cst_64 {dimension_numbers = #tpu.dot_dimension_numbers<[1], [0], [0], [1], [0, 0, 1, 1], [], []>} : vector<16x32xbf16>, vector<32x128xbf16>, vector<16x128xf32> -> vector<16x128xf32>
    %189 = vector.broadcast %17 : vector<1x128xf32> to vector<16x128xf32>
    %190 = arith.addf %188, %189 : vector<16x128xf32>
    %cst_65 = arith.constant 5.000000e-01 : f32
    %191 = vector.broadcast %cst_65 : f32 to vector<16x128xf32>
    %192 = arith.mulf %191, %190 : vector<16x128xf32>
    %cst_66 = arith.constant 4.471500e-02 : f32
    %193 = vector.broadcast %cst_66 : f32 to vector<16x128xf32>
    %194 = arith.mulf %193, %190 : vector<16x128xf32>
    %195 = arith.mulf %194, %190 : vector<16x128xf32>
    %196 = arith.mulf %195, %190 : vector<16x128xf32>
    %197 = arith.addf %190, %196 : vector<16x128xf32>
    %cst_67 = arith.constant 0.797884583 : f32
    %198 = vector.broadcast %cst_67 : f32 to vector<16x128xf32>
    %199 = arith.mulf %198, %197 : vector<16x128xf32>
    %200 = math.tanh %199 : vector<16x128xf32>
    %cst_68 = arith.constant 1.000000e+00 : f32
    %201 = vector.broadcast %cst_68 : f32 to vector<16x128xf32>
    %202 = arith.addf %201, %200 : vector<16x128xf32>
    %203 = arith.mulf %192, %202 : vector<16x128xf32>
    %204 = arith.truncf %203 : vector<16x128xf32> to vector<16x128xbf16>
    %cst_69 = arith.constant dense<0.000000e+00> : vector<16x32xf32>
    %205 = tpu.matmul %204, %18, %cst_69 {dimension_numbers = #tpu.dot_dimension_numbers<[1], [0], [0], [1], [0, 0, 1, 1], [], []>} : vector<16x128xbf16>, vector<128x32xbf16>, vector<16x32xf32> -> vector<16x32xf32>
    %206 = vector.broadcast %19 : vector<1x32xf32> to vector<16x32xf32>
    %207 = arith.addf %205, %206 : vector<16x32xf32>
    %208 = arith.addf %164, %207 : vector<16x32xf32>
    %c0_70 = arith.constant 0 : index
    %c0_71 = arith.constant 0 : index
    %209 = vector.load %arg14[%c0_70, %c0_71] : memref<1x32xf32, #tpu.memory_space<vmem>>, vector<1x32xf32>
    %c0_72 = arith.constant 0 : index
    %c0_73 = arith.constant 0 : index
    %210 = vector.load %arg15[%c0_72, %c0_73] : memref<1x32xf32, #tpu.memory_space<vmem>>, vector<1x32xf32>
    %c0_74 = arith.constant 0 : index
    %c0_75 = arith.constant 0 : index
    %211 = vector.load %arg16[%c0_74, %c0_75] : memref<32x96xbf16, #tpu.memory_space<vmem>>, vector<32x96xbf16>
    %c0_76 = arith.constant 0 : index
    %c0_77 = arith.constant 0 : index
    %212 = vector.load %arg17[%c0_76, %c0_77] : memref<1x96xf32, #tpu.memory_space<vmem>>, vector<1x96xf32>
    %c0_78 = arith.constant 0 : index
    %c0_79 = arith.constant 0 : index
    %213 = vector.load %arg18[%c0_78, %c0_79] : memref<32x32xbf16, #tpu.memory_space<vmem>>, vector<32x32xbf16>
    %c0_80 = arith.constant 0 : index
    %c0_81 = arith.constant 0 : index
    %214 = vector.load %arg19[%c0_80, %c0_81] : memref<1x32xf32, #tpu.memory_space<vmem>>, vector<1x32xf32>
    %c0_82 = arith.constant 0 : index
    %c0_83 = arith.constant 0 : index
    %215 = vector.load %arg20[%c0_82, %c0_83] : memref<1x32xf32, #tpu.memory_space<vmem>>, vector<1x32xf32>
    %c0_84 = arith.constant 0 : index
    %c0_85 = arith.constant 0 : index
    %216 = vector.load %arg21[%c0_84, %c0_85] : memref<1x32xf32, #tpu.memory_space<vmem>>, vector<1x32xf32>
    %c0_86 = arith.constant 0 : index
    %c0_87 = arith.constant 0 : index
    %217 = vector.load %arg22[%c0_86, %c0_87] : memref<32x128xbf16, #tpu.memory_space<vmem>>, vector<32x128xbf16>
    %c0_88 = arith.constant 0 : index
    %c0_89 = arith.constant 0 : index
    %218 = vector.load %arg23[%c0_88, %c0_89] : memref<1x128xf32, #tpu.memory_space<vmem>>, vector<1x128xf32>
    %c0_90 = arith.constant 0 : index
    %c0_91 = arith.constant 0 : index
    %219 = vector.load %arg24[%c0_90, %c0_91] : memref<128x32xbf16, #tpu.memory_space<vmem>>, vector<128x32xbf16>
    %c0_92 = arith.constant 0 : index
    %c0_93 = arith.constant 0 : index
    %220 = vector.load %arg25[%c0_92, %c0_93] : memref<1x32xf32, #tpu.memory_space<vmem>>, vector<1x32xf32>
    %cst_94 = arith.constant dense<0.000000e+00> : vector<16xf32>
    %221 = vector.multi_reduction <add>, %208, %cst_94 [1] : vector<16x32xf32> to vector<16xf32>
    %222 = vector.shape_cast %221 : vector<16xf32> to vector<16x1xf32>
    %cst_95 = arith.constant 3.200000e+01 : f32
    %223 = vector.broadcast %cst_95 : f32 to vector<16x1xf32>
    %224 = arith.divf %222, %223 : vector<16x1xf32>
    %225 = vector.broadcast %224 : vector<16x1xf32> to vector<16x32xf32>
    %226 = arith.subf %208, %225 : vector<16x32xf32>
    %227 = arith.mulf %226, %226 : vector<16x32xf32>
    %cst_96 = arith.constant dense<0.000000e+00> : vector<16xf32>
    %228 = vector.multi_reduction <add>, %227, %cst_96 [1] : vector<16x32xf32> to vector<16xf32>
    %229 = vector.shape_cast %228 : vector<16xf32> to vector<16x1xf32>
    %cst_97 = arith.constant 3.200000e+01 : f32
    %230 = vector.broadcast %cst_97 : f32 to vector<16x1xf32>
    %231 = arith.divf %229, %230 : vector<16x1xf32>
    %232 = vector.broadcast %224 : vector<16x1xf32> to vector<16x32xf32>
    %233 = arith.subf %208, %232 : vector<16x32xf32>
    %cst_98 = arith.constant 9.99999974E-6 : f32
    %234 = vector.broadcast %cst_98 : f32 to vector<16x1xf32>
    %235 = arith.addf %231, %234 : vector<16x1xf32>
    %236 = math.rsqrt %235 : vector<16x1xf32>
    %237 = vector.broadcast %236 : vector<16x1xf32> to vector<16x32xf32>
    %238 = arith.mulf %233, %237 : vector<16x32xf32>
    %239 = vector.broadcast %209 : vector<1x32xf32> to vector<16x32xf32>
    %240 = arith.mulf %238, %239 : vector<16x32xf32>
    %241 = vector.broadcast %210 : vector<1x32xf32> to vector<16x32xf32>
    %242 = arith.addf %240, %241 : vector<16x32xf32>
    %243 = arith.truncf %242 : vector<16x32xf32> to vector<16x32xbf16>
    %cst_99 = arith.constant dense<0.000000e+00> : vector<16x96xf32>
    %244 = tpu.matmul %243, %211, %cst_99 {dimension_numbers = #tpu.dot_dimension_numbers<[1], [0], [0], [1], [0, 0, 1, 1], [], []>} : vector<16x32xbf16>, vector<32x96xbf16>, vector<16x96xf32> -> vector<16x96xf32>
    %245 = vector.broadcast %212 : vector<1x96xf32> to vector<16x96xf32>
    %246 = arith.addf %244, %245 : vector<16x96xf32>
    %247 = vector.extract_strided_slice %246 {offsets = [0, 0], sizes = [16, 32], strides = [1, 1]} : vector<16x96xf32> to vector<16x32xf32>
    %248 = vector.extract_strided_slice %246 {offsets = [0, 32], sizes = [16, 32], strides = [1, 1]} : vector<16x96xf32> to vector<16x32xf32>
    %249 = vector.extract_strided_slice %246 {offsets = [0, 64], sizes = [16, 32], strides = [1, 1]} : vector<16x96xf32> to vector<16x32xf32>
    %250 = vector.extract_strided_slice %247 {offsets = [0, 0], sizes = [8, 32], strides = [1, 1]} : vector<16x32xf32> to vector<8x32xf32>
    %251 = vector.extract_strided_slice %248 {offsets = [0, 0], sizes = [8, 32], strides = [1, 1]} : vector<16x32xf32> to vector<8x32xf32>
    %252 = vector.extract_strided_slice %249 {offsets = [0, 0], sizes = [8, 32], strides = [1, 1]} : vector<16x32xf32> to vector<8x32xf32>
    %253 = vector.extract_strided_slice %1 {offsets = [0, 0], sizes = [1, 8], strides = [1, 1]} : vector<2x8xf32> to vector<1x8xf32>
    %cst_100 = arith.constant 1.000000e+00 : f32
    %254 = vector.broadcast %cst_100 : f32 to vector<1x8xf32>
    %255 = arith.subf %254, %253 : vector<1x8xf32>
    %cst_101 = arith.constant -1.000000e+09 : f32
    %256 = vector.broadcast %cst_101 : f32 to vector<1x8xf32>
    %257 = arith.mulf %255, %256 : vector<1x8xf32>
    %258 = vector.broadcast %257 : vector<1x8xf32> to vector<8x8xf32>
    %259 = arith.addf %7, %258 : vector<8x8xf32>
    %260 = vector.extract_strided_slice %250 {offsets = [0, 0], sizes = [8, 16], strides = [1, 1]} : vector<8x32xf32> to vector<8x16xf32>
    %261 = arith.truncf %260 : vector<8x16xf32> to vector<8x16xbf16>
    %262 = vector.extract_strided_slice %251 {offsets = [0, 0], sizes = [8, 16], strides = [1, 1]} : vector<8x32xf32> to vector<8x16xf32>
    %263 = arith.truncf %262 : vector<8x16xf32> to vector<8x16xbf16>
    %264 = vector.extract_strided_slice %252 {offsets = [0, 0], sizes = [8, 16], strides = [1, 1]} : vector<8x32xf32> to vector<8x16xf32>
    %265 = arith.truncf %264 : vector<8x16xf32> to vector<8x16xbf16>
    %cst_102 = arith.constant dense<0.000000e+00> : vector<8x8xf32>
    %266 = tpu.matmul %261, %263, %cst_102 {dimension_numbers = #tpu.dot_dimension_numbers<[1], [1], [0], [0], [0, 0, 1, 0], [], []>} : vector<8x16xbf16>, vector<8x16xbf16>, vector<8x8xf32> -> vector<8x8xf32>
    %cst_103 = arith.constant 2.500000e-01 : f32
    %267 = vector.broadcast %cst_103 : f32 to vector<8x8xf32>
    %268 = arith.mulf %266, %267 : vector<8x8xf32>
    %269 = arith.addf %268, %259 : vector<8x8xf32>
    %cst_104 = arith.constant dense<0xFF800000> : vector<8xf32>
    %270 = vector.multi_reduction <maximumf>, %269, %cst_104 [1] : vector<8x8xf32> to vector<8xf32>
    %271 = vector.shape_cast %270 : vector<8xf32> to vector<8x1xf32>
    %272 = vector.broadcast %271 : vector<8x1xf32> to vector<8x8xf32>
    %273 = arith.subf %269, %272 : vector<8x8xf32>
    %274 = math.exp %273 : vector<8x8xf32>
    %cst_105 = arith.constant dense<0.000000e+00> : vector<8xf32>
    %275 = vector.multi_reduction <add>, %274, %cst_105 [1] : vector<8x8xf32> to vector<8xf32>
    %276 = vector.shape_cast %275 : vector<8xf32> to vector<8x1xf32>
    %277 = tpu.reciprocal %276 {approx = true} : vector<8x1xf32> -> vector<8x1xf32>
    %278 = vector.broadcast %277 : vector<8x1xf32> to vector<8x8xf32>
    %279 = arith.mulf %274, %278 : vector<8x8xf32>
    %280 = arith.truncf %279 : vector<8x8xf32> to vector<8x8xbf16>
    %cst_106 = arith.constant dense<0.000000e+00> : vector<8x16xf32>
    %281 = tpu.matmul %280, %265, %cst_106 {dimension_numbers = #tpu.dot_dimension_numbers<[1], [0], [0], [1], [0, 0, 1, 1], [], []>} : vector<8x8xbf16>, vector<8x16xbf16>, vector<8x16xf32> -> vector<8x16xf32>
    %282 = vector.extract_strided_slice %250 {offsets = [0, 16], sizes = [8, 16], strides = [1, 1]} : vector<8x32xf32> to vector<8x16xf32>
    %283 = arith.truncf %282 : vector<8x16xf32> to vector<8x16xbf16>
    %284 = vector.extract_strided_slice %251 {offsets = [0, 16], sizes = [8, 16], strides = [1, 1]} : vector<8x32xf32> to vector<8x16xf32>
    %285 = arith.truncf %284 : vector<8x16xf32> to vector<8x16xbf16>
    %286 = vector.extract_strided_slice %252 {offsets = [0, 16], sizes = [8, 16], strides = [1, 1]} : vector<8x32xf32> to vector<8x16xf32>
    %287 = arith.truncf %286 : vector<8x16xf32> to vector<8x16xbf16>
    %cst_107 = arith.constant dense<0.000000e+00> : vector<8x8xf32>
    %288 = tpu.matmul %283, %285, %cst_107 {dimension_numbers = #tpu.dot_dimension_numbers<[1], [1], [0], [0], [0, 0, 1, 0], [], []>} : vector<8x16xbf16>, vector<8x16xbf16>, vector<8x8xf32> -> vector<8x8xf32>
    %cst_108 = arith.constant 2.500000e-01 : f32
    %289 = vector.broadcast %cst_108 : f32 to vector<8x8xf32>
    %290 = arith.mulf %288, %289 : vector<8x8xf32>
    %291 = arith.addf %290, %259 : vector<8x8xf32>
    %cst_109 = arith.constant dense<0xFF800000> : vector<8xf32>
    %292 = vector.multi_reduction <maximumf>, %291, %cst_109 [1] : vector<8x8xf32> to vector<8xf32>
    %293 = vector.shape_cast %292 : vector<8xf32> to vector<8x1xf32>
    %294 = vector.broadcast %293 : vector<8x1xf32> to vector<8x8xf32>
    %295 = arith.subf %291, %294 : vector<8x8xf32>
    %296 = math.exp %295 : vector<8x8xf32>
    %cst_110 = arith.constant dense<0.000000e+00> : vector<8xf32>
    %297 = vector.multi_reduction <add>, %296, %cst_110 [1] : vector<8x8xf32> to vector<8xf32>
    %298 = vector.shape_cast %297 : vector<8xf32> to vector<8x1xf32>
    %299 = tpu.reciprocal %298 {approx = true} : vector<8x1xf32> -> vector<8x1xf32>
    %300 = vector.broadcast %299 : vector<8x1xf32> to vector<8x8xf32>
    %301 = arith.mulf %296, %300 : vector<8x8xf32>
    %302 = arith.truncf %301 : vector<8x8xf32> to vector<8x8xbf16>
    %cst_111 = arith.constant dense<0.000000e+00> : vector<8x16xf32>
    %303 = tpu.matmul %302, %287, %cst_111 {dimension_numbers = #tpu.dot_dimension_numbers<[1], [0], [0], [1], [0, 0, 1, 1], [], []>} : vector<8x8xbf16>, vector<8x16xbf16>, vector<8x16xf32> -> vector<8x16xf32>
    %304 = tpu.concatenate %281, %303 in 1 : vector<8x16xf32>, vector<8x16xf32> -> vector<8x32xf32>
    %305 = vector.extract_strided_slice %247 {offsets = [8, 0], sizes = [8, 32], strides = [1, 1]} : vector<16x32xf32> to vector<8x32xf32>
    %306 = vector.extract_strided_slice %248 {offsets = [8, 0], sizes = [8, 32], strides = [1, 1]} : vector<16x32xf32> to vector<8x32xf32>
    %307 = vector.extract_strided_slice %249 {offsets = [8, 0], sizes = [8, 32], strides = [1, 1]} : vector<16x32xf32> to vector<8x32xf32>
    %308 = vector.extract_strided_slice %1 {offsets = [1, 0], sizes = [1, 8], strides = [1, 1]} : vector<2x8xf32> to vector<1x8xf32>
    %cst_112 = arith.constant 1.000000e+00 : f32
    %309 = vector.broadcast %cst_112 : f32 to vector<1x8xf32>
    %310 = arith.subf %309, %308 : vector<1x8xf32>
    %cst_113 = arith.constant -1.000000e+09 : f32
    %311 = vector.broadcast %cst_113 : f32 to vector<1x8xf32>
    %312 = arith.mulf %310, %311 : vector<1x8xf32>
    %313 = vector.broadcast %312 : vector<1x8xf32> to vector<8x8xf32>
    %314 = arith.addf %7, %313 : vector<8x8xf32>
    %315 = vector.extract_strided_slice %305 {offsets = [0, 0], sizes = [8, 16], strides = [1, 1]} : vector<8x32xf32> to vector<8x16xf32>
    %316 = arith.truncf %315 : vector<8x16xf32> to vector<8x16xbf16>
    %317 = vector.extract_strided_slice %306 {offsets = [0, 0], sizes = [8, 16], strides = [1, 1]} : vector<8x32xf32> to vector<8x16xf32>
    %318 = arith.truncf %317 : vector<8x16xf32> to vector<8x16xbf16>
    %319 = vector.extract_strided_slice %307 {offsets = [0, 0], sizes = [8, 16], strides = [1, 1]} : vector<8x32xf32> to vector<8x16xf32>
    %320 = arith.truncf %319 : vector<8x16xf32> to vector<8x16xbf16>
    %cst_114 = arith.constant dense<0.000000e+00> : vector<8x8xf32>
    %321 = tpu.matmul %316, %318, %cst_114 {dimension_numbers = #tpu.dot_dimension_numbers<[1], [1], [0], [0], [0, 0, 1, 0], [], []>} : vector<8x16xbf16>, vector<8x16xbf16>, vector<8x8xf32> -> vector<8x8xf32>
    %cst_115 = arith.constant 2.500000e-01 : f32
    %322 = vector.broadcast %cst_115 : f32 to vector<8x8xf32>
    %323 = arith.mulf %321, %322 : vector<8x8xf32>
    %324 = arith.addf %323, %314 : vector<8x8xf32>
    %cst_116 = arith.constant dense<0xFF800000> : vector<8xf32>
    %325 = vector.multi_reduction <maximumf>, %324, %cst_116 [1] : vector<8x8xf32> to vector<8xf32>
    %326 = vector.shape_cast %325 : vector<8xf32> to vector<8x1xf32>
    %327 = vector.broadcast %326 : vector<8x1xf32> to vector<8x8xf32>
    %328 = arith.subf %324, %327 : vector<8x8xf32>
    %329 = math.exp %328 : vector<8x8xf32>
    %cst_117 = arith.constant dense<0.000000e+00> : vector<8xf32>
    %330 = vector.multi_reduction <add>, %329, %cst_117 [1] : vector<8x8xf32> to vector<8xf32>
    %331 = vector.shape_cast %330 : vector<8xf32> to vector<8x1xf32>
    %332 = tpu.reciprocal %331 {approx = true} : vector<8x1xf32> -> vector<8x1xf32>
    %333 = vector.broadcast %332 : vector<8x1xf32> to vector<8x8xf32>
    %334 = arith.mulf %329, %333 : vector<8x8xf32>
    %335 = arith.truncf %334 : vector<8x8xf32> to vector<8x8xbf16>
    %cst_118 = arith.constant dense<0.000000e+00> : vector<8x16xf32>
    %336 = tpu.matmul %335, %320, %cst_118 {dimension_numbers = #tpu.dot_dimension_numbers<[1], [0], [0], [1], [0, 0, 1, 1], [], []>} : vector<8x8xbf16>, vector<8x16xbf16>, vector<8x16xf32> -> vector<8x16xf32>
    %337 = vector.extract_strided_slice %305 {offsets = [0, 16], sizes = [8, 16], strides = [1, 1]} : vector<8x32xf32> to vector<8x16xf32>
    %338 = arith.truncf %337 : vector<8x16xf32> to vector<8x16xbf16>
    %339 = vector.extract_strided_slice %306 {offsets = [0, 16], sizes = [8, 16], strides = [1, 1]} : vector<8x32xf32> to vector<8x16xf32>
    %340 = arith.truncf %339 : vector<8x16xf32> to vector<8x16xbf16>
    %341 = vector.extract_strided_slice %307 {offsets = [0, 16], sizes = [8, 16], strides = [1, 1]} : vector<8x32xf32> to vector<8x16xf32>
    %342 = arith.truncf %341 : vector<8x16xf32> to vector<8x16xbf16>
    %cst_119 = arith.constant dense<0.000000e+00> : vector<8x8xf32>
    %343 = tpu.matmul %338, %340, %cst_119 {dimension_numbers = #tpu.dot_dimension_numbers<[1], [1], [0], [0], [0, 0, 1, 0], [], []>} : vector<8x16xbf16>, vector<8x16xbf16>, vector<8x8xf32> -> vector<8x8xf32>
    %cst_120 = arith.constant 2.500000e-01 : f32
    %344 = vector.broadcast %cst_120 : f32 to vector<8x8xf32>
    %345 = arith.mulf %343, %344 : vector<8x8xf32>
    %346 = arith.addf %345, %314 : vector<8x8xf32>
    %cst_121 = arith.constant dense<0xFF800000> : vector<8xf32>
    %347 = vector.multi_reduction <maximumf>, %346, %cst_121 [1] : vector<8x8xf32> to vector<8xf32>
    %348 = vector.shape_cast %347 : vector<8xf32> to vector<8x1xf32>
    %349 = vector.broadcast %348 : vector<8x1xf32> to vector<8x8xf32>
    %350 = arith.subf %346, %349 : vector<8x8xf32>
    %351 = math.exp %350 : vector<8x8xf32>
    %cst_122 = arith.constant dense<0.000000e+00> : vector<8xf32>
    %352 = vector.multi_reduction <add>, %351, %cst_122 [1] : vector<8x8xf32> to vector<8xf32>
    %353 = vector.shape_cast %352 : vector<8xf32> to vector<8x1xf32>
    %354 = tpu.reciprocal %353 {approx = true} : vector<8x1xf32> -> vector<8x1xf32>
    %355 = vector.broadcast %354 : vector<8x1xf32> to vector<8x8xf32>
    %356 = arith.mulf %351, %355 : vector<8x8xf32>
    %357 = arith.truncf %356 : vector<8x8xf32> to vector<8x8xbf16>
    %cst_123 = arith.constant dense<0.000000e+00> : vector<8x16xf32>
    %358 = tpu.matmul %357, %342, %cst_123 {dimension_numbers = #tpu.dot_dimension_numbers<[1], [0], [0], [1], [0, 0, 1, 1], [], []>} : vector<8x8xbf16>, vector<8x16xbf16>, vector<8x16xf32> -> vector<8x16xf32>
    %359 = tpu.concatenate %336, %358 in 1 : vector<8x16xf32>, vector<8x16xf32> -> vector<8x32xf32>
    %360 = tpu.concatenate %304, %359 in 0 : vector<8x32xf32>, vector<8x32xf32> -> vector<16x32xf32>
    %361 = arith.truncf %360 : vector<16x32xf32> to vector<16x32xbf16>
    %cst_124 = arith.constant dense<0.000000e+00> : vector<16x32xf32>
    %362 = tpu.matmul %361, %213, %cst_124 {dimension_numbers = #tpu.dot_dimension_numbers<[1], [0], [0], [1], [0, 0, 1, 1], [], []>} : vector<16x32xbf16>, vector<32x32xbf16>, vector<16x32xf32> -> vector<16x32xf32>
    %363 = vector.broadcast %214 : vector<1x32xf32> to vector<16x32xf32>
    %364 = arith.addf %362, %363 : vector<16x32xf32>
    %365 = arith.addf %208, %364 : vector<16x32xf32>
    %cst_125 = arith.constant dense<0.000000e+00> : vector<16xf32>
    %366 = vector.multi_reduction <add>, %365, %cst_125 [1] : vector<16x32xf32> to vector<16xf32>
    %367 = vector.shape_cast %366 : vector<16xf32> to vector<16x1xf32>
    %cst_126 = arith.constant 3.200000e+01 : f32
    %368 = vector.broadcast %cst_126 : f32 to vector<16x1xf32>
    %369 = arith.divf %367, %368 : vector<16x1xf32>
    %370 = vector.broadcast %369 : vector<16x1xf32> to vector<16x32xf32>
    %371 = arith.subf %365, %370 : vector<16x32xf32>
    %372 = arith.mulf %371, %371 : vector<16x32xf32>
    %cst_127 = arith.constant dense<0.000000e+00> : vector<16xf32>
    %373 = vector.multi_reduction <add>, %372, %cst_127 [1] : vector<16x32xf32> to vector<16xf32>
    %374 = vector.shape_cast %373 : vector<16xf32> to vector<16x1xf32>
    %cst_128 = arith.constant 3.200000e+01 : f32
    %375 = vector.broadcast %cst_128 : f32 to vector<16x1xf32>
    %376 = arith.divf %374, %375 : vector<16x1xf32>
    %377 = vector.broadcast %369 : vector<16x1xf32> to vector<16x32xf32>
    %378 = arith.subf %365, %377 : vector<16x32xf32>
    %cst_129 = arith.constant 9.99999974E-6 : f32
    %379 = vector.broadcast %cst_129 : f32 to vector<16x1xf32>
    %380 = arith.addf %376, %379 : vector<16x1xf32>
    %381 = math.rsqrt %380 : vector<16x1xf32>
    %382 = vector.broadcast %381 : vector<16x1xf32> to vector<16x32xf32>
    %383 = arith.mulf %378, %382 : vector<16x32xf32>
    %384 = vector.broadcast %215 : vector<1x32xf32> to vector<16x32xf32>
    %385 = arith.mulf %383, %384 : vector<16x32xf32>
    %386 = vector.broadcast %216 : vector<1x32xf32> to vector<16x32xf32>
    %387 = arith.addf %385, %386 : vector<16x32xf32>
    %388 = arith.truncf %387 : vector<16x32xf32> to vector<16x32xbf16>
    %cst_130 = arith.constant dense<0.000000e+00> : vector<16x128xf32>
    %389 = tpu.matmul %388, %217, %cst_130 {dimension_numbers = #tpu.dot_dimension_numbers<[1], [0], [0], [1], [0, 0, 1, 1], [], []>} : vector<16x32xbf16>, vector<32x128xbf16>, vector<16x128xf32> -> vector<16x128xf32>
    %390 = vector.broadcast %218 : vector<1x128xf32> to vector<16x128xf32>
    %391 = arith.addf %389, %390 : vector<16x128xf32>
    %cst_131 = arith.constant 5.000000e-01 : f32
    %392 = vector.broadcast %cst_131 : f32 to vector<16x128xf32>
    %393 = arith.mulf %392, %391 : vector<16x128xf32>
    %cst_132 = arith.constant 4.471500e-02 : f32
    %394 = vector.broadcast %cst_132 : f32 to vector<16x128xf32>
    %395 = arith.mulf %394, %391 : vector<16x128xf32>
    %396 = arith.mulf %395, %391 : vector<16x128xf32>
    %397 = arith.mulf %396, %391 : vector<16x128xf32>
    %398 = arith.addf %391, %397 : vector<16x128xf32>
    %cst_133 = arith.constant 0.797884583 : f32
    %399 = vector.broadcast %cst_133 : f32 to vector<16x128xf32>
    %400 = arith.mulf %399, %398 : vector<16x128xf32>
    %401 = math.tanh %400 : vector<16x128xf32>
    %cst_134 = arith.constant 1.000000e+00 : f32
    %402 = vector.broadcast %cst_134 : f32 to vector<16x128xf32>
    %403 = arith.addf %402, %401 : vector<16x128xf32>
    %404 = arith.mulf %393, %403 : vector<16x128xf32>
    %405 = arith.truncf %404 : vector<16x128xf32> to vector<16x128xbf16>
    %cst_135 = arith.constant dense<0.000000e+00> : vector<16x32xf32>
    %406 = tpu.matmul %405, %219, %cst_135 {dimension_numbers = #tpu.dot_dimension_numbers<[1], [0], [0], [1], [0, 0, 1, 1], [], []>} : vector<16x128xbf16>, vector<128x32xbf16>, vector<16x32xf32> -> vector<16x32xf32>
    %407 = vector.broadcast %220 : vector<1x32xf32> to vector<16x32xf32>
    %408 = arith.addf %406, %407 : vector<16x32xf32>
    %409 = arith.addf %365, %408 : vector<16x32xf32>
    %c0_136 = arith.constant 0 : index
    %c0_137 = arith.constant 0 : index
    %410 = vector.load %arg26[%c0_136, %c0_137] : memref<1x32xf32, #tpu.memory_space<vmem>>, vector<1x32xf32>
    %c0_138 = arith.constant 0 : index
    %c0_139 = arith.constant 0 : index
    %411 = vector.load %arg27[%c0_138, %c0_139] : memref<1x32xf32, #tpu.memory_space<vmem>>, vector<1x32xf32>
    %c0_140 = arith.constant 0 : index
    %c0_141 = arith.constant 0 : index
    %412 = vector.load %arg28[%c0_140, %c0_141] : memref<32x1xf32, #tpu.memory_space<vmem>>, vector<32x1xf32>
    %c0_142 = arith.constant 0 : index
    %c0_143 = arith.constant 0 : index
    %413 = vector.load %arg29[%c0_142, %c0_143] : memref<1x1xf32, #tpu.memory_space<vmem>>, vector<1x1xf32>
    %414 = vector.extract_strided_slice %409 {offsets = [0, 0], sizes = [1, 32], strides = [1, 1]} : vector<16x32xf32> to vector<1x32xf32>
    %415 = vector.extract_strided_slice %409 {offsets = [8, 0], sizes = [1, 32], strides = [1, 1]} : vector<16x32xf32> to vector<1x32xf32>
    %416 = tpu.concatenate %414, %415 in 0 : vector<1x32xf32>, vector<1x32xf32> -> vector<2x32xf32>
    %cst_144 = arith.constant dense<0.000000e+00> : vector<2xf32>
    %417 = vector.multi_reduction <add>, %416, %cst_144 [1] : vector<2x32xf32> to vector<2xf32>
    %418 = vector.shape_cast %417 : vector<2xf32> to vector<2x1xf32>
    %cst_145 = arith.constant 3.200000e+01 : f32
    %419 = vector.broadcast %cst_145 : f32 to vector<2x1xf32>
    %420 = arith.divf %418, %419 : vector<2x1xf32>
    %421 = vector.broadcast %420 : vector<2x1xf32> to vector<2x32xf32>
    %422 = arith.subf %416, %421 : vector<2x32xf32>
    %423 = arith.mulf %422, %422 : vector<2x32xf32>
    %cst_146 = arith.constant dense<0.000000e+00> : vector<2xf32>
    %424 = vector.multi_reduction <add>, %423, %cst_146 [1] : vector<2x32xf32> to vector<2xf32>
    %425 = vector.shape_cast %424 : vector<2xf32> to vector<2x1xf32>
    %cst_147 = arith.constant 3.200000e+01 : f32
    %426 = vector.broadcast %cst_147 : f32 to vector<2x1xf32>
    %427 = arith.divf %425, %426 : vector<2x1xf32>
    %428 = vector.broadcast %420 : vector<2x1xf32> to vector<2x32xf32>
    %429 = arith.subf %416, %428 : vector<2x32xf32>
    %cst_148 = arith.constant 9.99999974E-6 : f32
    %430 = vector.broadcast %cst_148 : f32 to vector<2x1xf32>
    %431 = arith.addf %427, %430 : vector<2x1xf32>
    %432 = math.rsqrt %431 : vector<2x1xf32>
    %433 = vector.broadcast %432 : vector<2x1xf32> to vector<2x32xf32>
    %434 = arith.mulf %429, %433 : vector<2x32xf32>
    %435 = vector.broadcast %410 : vector<1x32xf32> to vector<2x32xf32>
    %436 = arith.mulf %434, %435 : vector<2x32xf32>
    %437 = vector.broadcast %411 : vector<1x32xf32> to vector<2x32xf32>
    %438 = arith.addf %436, %437 : vector<2x32xf32>
    %439 = arith.truncf %438 : vector<2x32xf32> to vector<2x32xbf16>
    %440 = arith.truncf %412 : vector<32x1xf32> to vector<32x1xbf16>
    %cst_149 = arith.constant dense<0.000000e+00> : vector<2x1xf32>
    %441 = tpu.matmul %439, %440, %cst_149 {dimension_numbers = #tpu.dot_dimension_numbers<[1], [0], [0], [1], [0, 0, 1, 1], [], []>} : vector<2x32xbf16>, vector<32x1xbf16>, vector<2x1xf32> -> vector<2x1xf32>
    %442 = vector.broadcast %413 : vector<1x1xf32> to vector<2x1xf32>
    %443 = arith.addf %441, %442 : vector<2x1xf32>
    %c0_150 = arith.constant 0 : index
    %c0_151 = arith.constant 0 : index
    %444 = vector.load %arg30[%c0_150, %c0_151] : memref<2x1xf32, #tpu.memory_space<vmem>>, vector<2x1xf32>
    tpu.vector_store %arg30[%c0_150, %c0_151], %443 {strides = array<i32>} : memref<2x1xf32, #tpu.memory_space<vmem>>, vector<2x1xf32>,
    return
  }
}

</mosaic_0001>

<bundles_post_ra>
// kernel: reward_model_forward.1
= control target key start
LH: loop header
LB: loop body
LE: loop exit
PB: predicated region body
PF: predicated region fallthrough
CT: control target
= control target key end

     0   :  { %vm174_vm0 = vcmask 261120   ;;  %s2520_s6 = smov 4   ;;  %v2521_v15 = vmov 0.0   ;;  %vm2522_vm1 = vmmov 0   ;;  %s2523_s10 = smov 2   ;;  %vm292_vm2 = vcmask 130048   ;;  %s2941_s0 = inlined_call_operand.smem [shape: u32[31], index: -1, kind: input, shape index: {}] }
   0x1   :  { %s1_s5 = sld [smem:[%s2941_s0]]   ;;  %2194 = vmatprep.subr.bf16.mxu1 %v2521_v15  ;;  %2208 = vmatprep.subr.bf16.mxu0 %v2521_v15  ;;  %s2524_s14 = smov 3   ;;  %v132_v53 = vlaneseq  ;;  %v2530_v61 = vmov -1e+09   ;;  %vm341_vm4 = vcmask 64512   ;;  %vm359_vm5 = vcmask 1043456  }
   0x2   :  { %s2026_s9 = sld [smem:[%s2941_s0 + %s2520_s6]]   ;;  %2198 = vmatprep.mubr.msk.bf16.mxu1 %vm2522_vm1, %v2521_v15  ;;  %2210 = vmatprep.mubr.msk.bf16.mxu0 %vm2522_vm1, %v2521_v15  ;;  %s2525_s18 = smov 5   ;;  %vm1935_vm6 = vcmask 1040384   ;;  %vm1937_vm7 = vcmask 254976   ;;  %vm2017_vm8 = vcmask 1024  }
   0x3   :  { %s2024_s13 = sld [smem:[%s2941_s0 + %s2523_s10]]   ;;  %s2526_s22 = smov 80   ;;  %v133_v55 = vshrl.u32 %v132_v53, 7  ;;  %v135_v57 = vand.u32 127, %v132_v53 }
   0x4   :  { %s2025_s17 = sld [smem:[%s2941_s0 + %s2524_s14]]   ;;  %s2527_s23 = smov 96  }
   0x5   :  { %s2027_s21 = sld [smem:[%s2941_s0 + %s2525_s18]]   ;;  %s2528_s24 = smov 112   ;;  %v285_v59 = vsub.s32 0, %v133_v55  ;;  %vm136_vm3 = vcmp.le.s32.totalorder %v135_v57, %v133_v55 }
   0x6   :  { %s2529_s25 = smov 1   ;;  %v137_v62 = vsel %vm136_vm3, 0.0, %v2530_v61  ;;  %s2531_s29 = smov 48  }
   0x7   :  { %v2566_v0 = vld [vmem:[%s1_s5] sm:$0xff]  ;;  %v2568_v1 = vld [vmem:[%s1_s5 + $0x8] sm:$0xff]  ;;  %s2023_s28 = sld [smem:[%s2941_s0 + %s2529_s25]]   ;;  %s2532_s30 = smov 64  }
   0x8   :  { %v175_v2 = vsel %vm174_vm0, %v2566_v0, 0.0  ;;  %v178_v3 = vsel %vm174_vm0, %v2568_v1, 0.0  ;;  %v2434_v14 = vld [vmem:[%s2026_s9] sm:$0xff]   ;;  %v2435_v16 = vld [vmem:[%s2026_s9 + $0x8] sm:$0xff]   ;;  %s2533_s1 = smov 16   ;;  %s2534_s5 = smov 6  }
   0x9   :  { %176 = vadd.xlane.f32.xlu0 %v175_v2  ;;  %2195 = vmatpush3.bf16.msra.mxu1 %v2434_v14  ;;  %v2053_v25 = vld [vmem:[%s2024_s13] ss:$0 sm:$0xff]  ;;  %s2690_s4 = sld [smem:[%s2941_s0 + %s2533_s1]]   ;;  %s2535_s9 = smov 7  }
   0xa   :  { %2196 = vmatprep.subr.bf16.mxu1 %v2521_v15  ;;  %v2054_v29 = vld [vmem:[%s2025_s17] ss:$0 sm:$0xff]  ;;  %s2028_s8 = sld [smem:[%s2941_s0 + %s2534_s5]]   ;;  %s2536_s13 = smov 10  }
   0xb   :  { %v2055_v34 = vld [vmem:[%s2027_s21] ss:$0 sm:$0xff]  ;;  %s2029_s12 = sld [smem:[%s2941_s0 + %s2535_s9]]   ;;  %s2537_s17 = smov 8  }
   0xc   :  { %s2032_s16 = sld [smem:[%s2941_s0 + %s2536_s13]]   ;;  %s2538_s21 = smov 9  }
   0xd   :  { %179 = vadd.xlane.f32.xlu0 %v178_v3  ;;  %2197 = vmatpush3.bf16.msra.mxu1 %v2435_v16  ;;  %v131_v54 = vld [vmem:[%s2023_s28] sm:$0x3]  ;;  %s2030_s20 = sld [smem:[%s2941_s0 + %s2537_s17]]   ;;  %s2539_s28 = smov 12  }
   0xe   :  { %2202 = vmatprep.subr.bf16.mxu1 %v2521_v15  ;;  %v281_v56 = vsub.f32 1.0, %v131_v54  ;;  %s2031_s27 = sld [smem:[%s2941_s0 + %s2538_s21]]   ;;  %s2540_s6 = smov 11  }
   0xf   :  { %s2034_s5 = sld [smem:[%s2941_s0 + %s2539_s28]]   ;;  %s2541_s10 = smov 13  }
  0x10   :  { %v282_v58 = vmul.f32 -1e+09, %v281_v56  ;;  %s2033_s9 = sld [smem:[%s2941_s0 + %s2540_s6]]   ;;  %s2542_s14 = smov 14  }
  0x11   :  { %s2035_s13 = sld [smem:[%s2941_s0 + %s2541_s10]]   ;;  %s2543_s18 = smov 15  }
  0x12   :  { %v286_v60 = vrot.slane %v282_v58, %v285_v59  ;;  %s2036_s17 = sld [smem:[%s2941_s0 + %s2542_s14]]   ;;  %s2544_s21 = smov 17  }
  0x13   :  { %s2547_s3 = smov 22   ;;  %s2551_s19 = smov 23  }
  0x14   :  { %v2642_v63 = vadd.f32 %v286_v60, %v137_v62  ;;  %s2044_s7 = sld [smem:[%s2941_s0 + %s2547_s3]]   ;;  %s2552_s26 = smov 25  }
  0x15   :  { %s2045_s25 = sld [smem:[%s2941_s0 + %s2551_s19]]   ;;  %s2554_s2 = smov 29  }
  0x16   :  { %s2555_s6 = smov 26   ;;  %s2556_s10 = smov 27  }
  0x17   :  { %s2557_s14 = smov 30  }
  0x96   :  { %v177_v4 = vpop.xlane.xlu0 %176 }
  0x97   :  { %v182_v5 = vmul.f32 0.03125, %v177_v4 }
  0x99   :  { %v184_v6 = vsub.f32 %v2566_v0, %v182_v5 }
  0x9a   :  { %v180_v7 = vpop.xlane.xlu0 %179 }
  0x9b   :  { %v183_v8 = vmul.f32 0.03125, %v180_v7  ;;  %v186_v9 = vmul.f32 %v184_v6, %v184_v6 }
  0x9d   :  { %v185_v10 = vsub.f32 %v2568_v1, %v183_v8  ;;  %v188_v11 = vsel %vm174_vm0, %v186_v9, 0.0  ;;  %v522_v9 = vsub.s32 1, %v133_v55 }
  0x9e   :  { %189 = vadd.xlane.f32.xlu1 %v188_v11 }
  0x9f   :  { %v187_v12 = vmul.f32 %v185_v10, %v185_v10 }
  0xa1   :  { %v191_v13 = vsel %vm174_vm0, %v187_v12, 0.0 }
  0xa2   :  { %192 = vadd.xlane.f32.xlu1 %v191_v13 }
 0x12b   :  { %v190_v17 = vpop.xlane.xlu1 %189 }
 0x12c   :  { %v194_v18 = vmul.f32 0.03125, %v190_v17  ;;  %v523_v17 = vrot.slane %v282_v58, %v522_v9 }
 0x12e   :  { %v196_v19 = vadd.f32 1e-05, %v194_v18 }
 0x12f   :  { %v193_v20 = vpop.xlane.xlu1 %192 }
 0x130   :  { %2462 = vrsqrt.f32 %v196_v19  ;;  %v195_v21 = vmul.f32 0.03125, %v193_v20  ;;  %v2648_v19 = vadd.f32 %v523_v17, %v137_v62 }
 0x132   :  { %v197_v22 = vadd.f32 1e-05, %v195_v21 }
 0x134   :  { %2464 = vrsqrt.f32 %v197_v22 }
 0x13a   :  { %v2463_v23 = vpop.eup %2462 }
 0x13b   :  { %v200_v24 = vmul.f32 %v2463_v23, %v184_v6 }
 0x13d   :  { %v208_v28 = vmul.f32 %v2053_v25, %v200_v24 }
 0x13e   :  { %v2465_v26 = vpop.eup %2464 }
 0x13f   :  { %v201_v27 = vmul.f32 %v2465_v26, %v185_v10  ;;  %v216_v31 = vadd.f32 %v2054_v29, %v208_v28 }
 0x141   :  { %v209_v30 = vmul.f32 %v2053_v25, %v201_v27 }
 0x143   :  { %v217_v32 = vadd.f32 %v2054_v29, %v209_v30 }
 0x145   :  { %v218_v33 = vpack.c.bf16 %v217_v32, %v216_v31 }
 0x147   :  { %2199 = vmatmul.mubr.msk.bf16.vlgmr.msra.gmra.mrb[0].mxu1 %vm174_vm0, %v218_v33 }
 0x148   :  { %2204 = vmatprep.mubr.msk.bf16.mxu1 %vm2522_vm1, %v2521_v15 }
 0x21a   :  { %v274_v35 = vpop.f32.mrb[0].mxu1 }
 0x21b   :  { %v275_v36 = vadd.f32 %v2055_v34, %v274_v35  ;;  %v2200_v37 = vpop.f32.mrb[1].mxu1 }
 0x21c   :  { %v277_v38 = vpop.f32.mrb[2].mxu1 }
 0x21d   :  { %v2601_v39 = vpack.c.bf16 %v275_v36, %v275_v36  ;;  %v278_v40 = vadd.f32 %v2055_v34, %v277_v38  ;;  %v2201_v41 = vpop.f32.mrb[3].mxu1 }
 0x21f   :  { %405 = vrot.lane.b32.xlu1 %v2601_v39, %s2526_s22  ;;  %290 = vrot.lane.b32.xlu0 %v2601_v39, %s2527_s23  ;;  %v2607_v42 = vpack.c.bf16 %v278_v40, %v278_v40 }
 0x223   :  { %403 = vrot.lane.b32.xlu1 %v2601_v39, %s2528_s24  ;;  %639 = vrot.lane.b32.xlu0 %v2607_v42, %s2526_s22 }
 0x227   :  { %527 = vrot.lane.b32.xlu1 %v2607_v42, %s2527_s23 }
 0x22b   :  { %637 = vrot.lane.b32.xlu1 %v2607_v42, %s2528_s24 }
 0x291   :  { %v291_v43 = vpop.permute.xlu0 %290  ;;  %v406_v45 = vpop.permute.xlu1 %405 }
 0x292   :  { %v297_v44 = vsel %vm292_vm2, %v291_v43, 0  ;;  %v411_v47 = vsel %vm292_vm2, %v406_v45, 0 }
 0x293   :  { %2203 = vmatpush3.bf16.xpose.msra.mxu1 %v297_v44 }
 0x294   :  { %2214 = vmatprep.subr.bf16.mxu1 %v2521_v15 }
 0x295   :  { %v404_v46 = vpop.permute.xlu1 %403  ;;  %v640_v50 = vpop.permute.xlu0 %639 }
 0x296   :  { %v645_v51 = vsel %vm292_vm2, %v640_v50, 0 }
 0x299   :  { %v528_v48 = vpop.permute.xlu1 %527 }
 0x29a   :  { %2205 = vmatmul.mubr.msk.bf16.vlgmr.msra.gmra.mrb[4].mxu1 %vm292_vm2, %v2601_v39  ;;  %v533_v49 = vsel %vm292_vm2, %v528_v48, 0 }
 0x29b   :  { %2215 = vmatpush3.bf16.xpose.msra.mxu1 %v411_v47  ;;  %2216 = vmatprep.mubr.msk.bf16.mxu1 %vm2522_vm1, %v2521_v15 }
 0x29c   :  { %2226 = vmatprep.subr.bf16.mxu1 %v2521_v15 }
 0x29d   :  { %v638_v52 = vpop.permute.xlu1 %637 }
 0x2a2   :  { %2217 = vmatmul.mubr.msk.bf16.vlgmr.msra.gmra.mrb[8].mxu1 %vm292_vm2, %v404_v46 }
 0x2a3   :  { %2227 = vmatpush3.bf16.xpose.msra.mxu1 %v533_v49  ;;  %2228 = vmatprep.mubr.msk.bf16.mxu1 %vm2522_vm1, %v2521_v15 }
 0x2a4   :  { %2238 = vmatprep.subr.bf16.mxu1 %v2521_v15 }
 0x2aa   :  { %2229 = vmatmul.mubr.msk.bf16.vlgmr.msra.gmra.mrb[12].mxu1 %vm292_vm2, %v2607_v42 }
 0x2ab   :  { %2239 = vmatpush3.bf16.xpose.msra.mxu1 %v645_v51  ;;  %2240 = vmatprep.mubr.msk.bf16.mxu1 %vm2522_vm1, %v2521_v15 }
 0x2ac   :  { %2250 = vmatprep.subr.bf16.mxu1 %v2521_v15 }
 0x2b2   :  { %2241 = vmatmul.mubr.msk.bf16.vlgmr.msra.gmra.mrb[16].mxu1 %vm292_vm2, %v638_v52 }
 0x2b3   :  { %2254 = vmatprep.mubr.msk.bf16.mxu1 %vm2522_vm1, %v2521_v15 }
 0x36d   :  { %v333_v2 = vpop.f32.mrb[4].mxu1 }
 0x36e   :  { %v339_v3 = vmul.f32 0.25, %v333_v2  ;;  %v2206_v4 = vpop.f32.mrb[5].mxu1 }
 0x36f   :  { %v336_v5 = vpop.f32.mrb[6].mxu1 }
 0x370   :  { %v2207_v6 = vpop.f32.mrb[7].mxu1  ;;  %v340_v7 = vadd.f32 %v339_v3, %v2642_v63 }
 0x372   :  { %v342_v8 = vsel %vm341_vm4, %v340_v7, -inf }
 0x373   :  { %343 = vmax.xlane.f32.xlu0 %v342_v8 }
 0x375   :  { %v447_v10 = vpop.f32.mrb[8].mxu1 }
 0x376   :  { %v453_v11 = vmul.f32 0.25, %v447_v10  ;;  %v2218_v12 = vpop.f32.mrb[9].mxu1 }
 0x377   :  { %v450_v13 = vpop.f32.mrb[10].mxu1 }
 0x378   :  { %v2219_v14 = vpop.f32.mrb[11].mxu1  ;;  %v454_v16 = vadd.f32 %v453_v11, %v2642_v63 }
 0x37a   :  { %v455_v18 = vsel %vm341_vm4, %v454_v16, -inf }
 0x37b   :  { %456 = vmax.xlane.f32.xlu1 %v455_v18  ;;  %v2436_v18 = vld [vmem:[%s2028_s8] sm:$0xff]  }
 0x37c   :  { %2251 = vmatpush3.bf16.msra.mxu1 %v2436_v18 }
 0x37d   :  { %v569_v20 = vpop.f32.mrb[12].mxu1  ;;  %2252 = vmatprep.subr.bf16.mxu1 %v2521_v15 }
 0x37e   :  { %v575_v21 = vmul.f32 0.25, %v569_v20  ;;  %v2230_v22 = vpop.f32.mrb[13].mxu1 }
 0x37f   :  { %v572_v23 = vpop.f32.mrb[14].mxu1 }
 0x380   :  { %v2231_v24 = vpop.f32.mrb[15].mxu1  ;;  %v576_v25 = vadd.f32 %v575_v21, %v2648_v19 }
 0x382   :  { %v577_v26 = vsel %vm341_vm4, %v576_v25, -inf }
 0x383   :  { %578 = vmax.xlane.f32.xlu0 %v577_v26 }
 0x385   :  { %v681_v27 = vpop.f32.mrb[16].mxu1 }
 0x386   :  { %v687_v28 = vmul.f32 0.25, %v681_v27  ;;  %v2242_v29 = vpop.f32.mrb[17].mxu1 }
 0x387   :  { %v684_v30 = vpop.f32.mrb[18].mxu1 }
 0x388   :  { %v2243_v31 = vpop.f32.mrb[19].mxu1  ;;  %v688_v32 = vadd.f32 %v687_v28, %v2648_v19 }
 0x38a   :  { %v689_v33 = vsel %vm341_vm4, %v688_v32, -inf }
 0x38b   :  { %690 = vmax.xlane.f32.xlu0 %v689_v33 }
 0x400   :  { %v344_v34 = vpop.xlane.xlu0 %343 }
 0x401   :  { %v345_v35 = vsub.f32 %v340_v7, %v344_v34 }
 0x403   :  { %v346_v36 = vmul.f32 1.442695, %v345_v35 }
 0x405   :  { %2466 = vpow2.f32 %v346_v36 }
 0x408   :  { %v457_v37 = vpop.xlane.xlu1 %456 }
 0x409   :  { %v458_v38 = vsub.f32 %v454_v16, %v457_v37 }
 0x40b   :  { %v459_v40 = vmul.f32 1.442695, %v458_v38 }
 0x40d   :  { %2468 = vpow2.f32 %v459_v40 }
 0x40f   :  { %v2467_v41 = vpop.eup %2466 }
 0x410   :  { %v579_v43 = vpop.xlane.xlu0 %578  ;;  %v348_v44 = vsel %vm341_vm4, %v2467_v41, 0.0 }
 0x411   :  { %v580_v45 = vsub.f32 %v576_v25, %v579_v43  ;;  %349 = vadd.xlane.f32.xlu0 %v348_v44 }
 0x413   :  { %v581_v46 = vmul.f32 1.442695, %v580_v45 }
 0x415   :  { %2470 = vpow2.f32 %v581_v46  ;;  %v2067_v46 = vld [vmem:[%s2029_s12] ss:$0 sm:$0xff]  ;;  %s2549_s12 = smov 21  }
 0x416   :  { %s2043_s15 = sld [smem:[%s2941_s0 + %s2549_s12]]  }
 0x417   :  { %v2469_v47 = vpop.eup %2468 }
 0x418   :  { %v461_v48 = vsel %vm341_vm4, %v2469_v47, 0.0  ;;  %v691_v51 = vpop.xlane.xlu0 %690 }
 0x419   :  { %462 = vadd.xlane.f32.xlu1 %v461_v48  ;;  %v692_v52 = vsub.f32 %v688_v32, %v691_v51  ;;  %v2437_v32 = vld [vmem:[%s2028_s8 + $0x8] sm:$0xff]   ;;  %s2548_s8 = smov 20  }
 0x41a   :  { %2253 = vmatpush3.bf16.msra.mxu1 %v2437_v32  ;;  %s2042_s11 = sld [smem:[%s2941_s0 + %s2548_s8]]  }
 0x41b   :  { %v693_v53 = vmul.f32 1.442695, %v692_v52  ;;  %2266 = vmatprep.subr.bf16.mxu1 %v2521_v15 }
 0x41d   :  { %2472 = vpow2.f32 %v693_v53 }
 0x41f   :  { %v2471_v49 = vpop.eup %2470 }
 0x420   :  { %v583_v50 = vsel %vm341_vm4, %v2471_v49, 0.0 }
 0x421   :  { %584 = vadd.xlane.f32.xlu0 %v583_v50 }
 0x427   :  { %v2473_v54 = vpop.eup %2472 }
 0x428   :  { %v695_v55 = vsel %vm341_vm4, %v2473_v54, 0.0 }
 0x42a   :  { %467 = vrot.lane.b32.xlu1 %v2601_v39, %s2531_s29 }
 0x42e   :  { %589 = vrot.lane.b32.xlu1 %v2607_v42, %s2532_s30 }
 0x437   :  { %354 = vrot.lane.b32.xlu0 %v2601_v39, %s2532_s30 }
 0x452   :  { %696 = vadd.xlane.f32.xlu1 %v695_v55 }
 0x463   :  { %701 = vrot.lane.b32.xlu1 %v2607_v42, %s2531_s29 }
 0x49e   :  { %v350_v56 = vpop.xlane.xlu0 %349 }
 0x49f   :  { %2474 = vrcp.f32 %v350_v56 }
 0x4a6   :  { %v463_v57 = vpop.xlane.xlu1 %462 }
 0x4a7   :  { %2476 = vrcp.f32 %v463_v57 }
 0x4a9   :  { %v2475_v58 = vpop.eup %2474 }
 0x4aa   :  { %v352_v60 = vmul.f32 %v2475_v58, %v2467_v41  ;;  %v468_v62 = vpop.permute.xlu1 %467 }
 0x4ab   :  { %v473_v42 = vsel %vm359_vm5, %v468_v62, 0 }
 0x4ac   :  { %v353_v2 = vpack.c.bf16 %v352_v60, %v352_v60 }
 0x4ae   :  { %v585_v59 = vpop.xlane.xlu0 %584  ;;  %v590_v5 = vpop.permute.xlu1 %589 }
 0x4af   :  { %2478 = vrcp.f32 %v585_v59  ;;  %v595_v8 = vsel %vm359_vm5, %v590_v5, 0 }
 0x4b1   :  { %v2477_v3 = vpop.eup %2476 }
 0x4b2   :  { %v355_v39 = vpop.permute.xlu0 %354  ;;  %v465_v4 = vmul.f32 %v2477_v3, %v2469_v47  ;;  %v2438_v3 = vld [vmem:[%s2032_s16] sm:$0xff]  }
 0x4b3   :  { %v361_v61 = vsel %vm359_vm5, %v355_v39, 0 }
 0x4b4   :  { %2209 = vmatpush3.bf16.msra.mxu0 %v361_v61  ;;  %v466_v6 = vpack.c.bf16 %v465_v4, %v465_v4 }
 0x4b5   :  { %2220 = vmatprep.subr.bf16.mxu0 %v2521_v15 }
 0x4b7   :  { %2211 = vmatmul.mubr.msk.bf16.vlgmr.msra.gmra.mrb[0].mxu0 %vm341_vm4, %v353_v2 }
 0x4b8   :  { %2221 = vmatpush3.bf16.msra.mxu0 %v473_v42  ;;  %2222 = vmatprep.mubr.msk.bf16.mxu0 %vm2522_vm1, %v2521_v15  ;;  %v2439_v42 = vld [vmem:[%s2032_s16 + $0x8] sm:$0xff]   ;;  %s2550_s16 = smov 24  }
 0x4b9   :  { %2232 = vmatprep.subr.bf16.mxu0 %v2521_v15  ;;  %v2479_v7 = vpop.eup %2478 }
 0x4ba   :  { %v587_v9 = vmul.f32 %v2479_v7, %v2471_v49 }
 0x4bc   :  { %v588_v10 = vpack.c.bf16 %v587_v9, %v587_v9 }
 0x4bf   :  { %2223 = vmatmul.mubr.msk.bf16.vlgmr.msra.gmra.mrb[4].mxu0 %vm341_vm4, %v466_v6 }
 0x4c0   :  { %2233 = vmatpush3.bf16.msra.mxu0 %v595_v8  ;;  %2234 = vmatprep.mubr.msk.bf16.mxu0 %vm2522_vm1, %v2521_v15 }
 0x4c1   :  { %2244 = vmatprep.subr.bf16.mxu0 %v2521_v15 }
 0x4c7   :  { %2235 = vmatmul.mubr.msk.bf16.vlgmr.msra.gmra.mrb[8].mxu0 %vm341_vm4, %v588_v10 }
 0x4c8   :  { %2246 = vmatprep.mubr.msk.bf16.mxu0 %vm2522_vm1, %v2521_v15 }
 0x4df   :  { %v697_v11 = vpop.xlane.xlu1 %696 }
 0x4e0   :  { %2480 = vrcp.f32 %v697_v11 }
 0x4e3   :  { %v702_v12 = vpop.permute.xlu1 %701 }
 0x4e4   :  { %v707_v13 = vsel %vm359_vm5, %v702_v12, 0  ;;  %v2071_v12 = vld [vmem:[%s2030_s20] ss:$0 sm:$0xff]  ;;  %s2037_s20 = sld [smem:[%s2941_s0 + %s2543_s18]]  }
 0x4e5   :  { %2245 = vmatpush3.bf16.msra.mxu0 %v707_v13 }
 0x4e6   :  { %2258 = vmatprep.subr.bf16.mxu0 %v2521_v15 }
 0x4ea   :  { %v2481_v14 = vpop.eup %2480 }
 0x4eb   :  { %v699_v16 = vmul.f32 %v2481_v14, %v2473_v54 }
 0x4ed   :  { %v700_v17 = vpack.c.bf16 %v699_v16, %v699_v16 }
 0x4ef   :  { %2247 = vmatmul.mubr.msk.bf16.vlgmr.msra.gmra.mrb[12].mxu0 %vm341_vm4, %v700_v17  ;;  %v2072_v17 = vld [vmem:[%s2031_s27] ss:$0 sm:$0xff]  ;;  %s2039_s27 = sld [smem:[%s2941_s0 + %s2544_s21]]  }
 0x4f0   :  { %2262 = vmatprep.mubr.msk.bf16.mxu0 %vm2522_vm1, %v2521_v15  ;;  %2259 = vmatpush3.bf16.msra.mxu0 %v2438_v3 }
 0x4f1   :  { %2260 = vmatprep.subr.bf16.mxu0 %v2521_v15 }
 0x4f4   :  { %2261 = vmatpush3.bf16.msra.mxu0 %v2439_v42 }
 0x4f5   :  { %2286 = vmatprep.subr.bf16.mxu0 %v2521_v15 }
 0x58a   :  { %v397_v20 = vpop.f32.mrb[0].mxu0 }
 0x58b   :  { %v2212_v21 = vpop.f32.mrb[1].mxu0 }
 0x58c   :  { %v400_v22 = vpop.f32.mrb[2].mxu0 }
 0x58d   :  { %v2213_v23 = vpop.f32.mrb[3].mxu0 }
 0x58e   :  { %v2440_v23 = vld [vmem:[%s2034_s5] sm:$0xff]  }
 0x592   :  { %v509_v24 = vpop.f32.mrb[4].mxu0 }
 0x593   :  { %v2224_v25 = vpop.f32.mrb[5].mxu0 }
 0x594   :  { %v512_v26 = vpop.f32.mrb[6].mxu0  ;;  %v2442_v25 = vld [vmem:[%s2034_s5 + $0x10] sm:$0xff]  }
 0x595   :  { %v2225_v27 = vpop.f32.mrb[7].mxu0  ;;  %v2443_v26 = vld [vmem:[%s2034_s5 + $0x18] sm:$0xff]  }
 0x596   :  { %v2444_v27 = vld [vmem:[%s2034_s5 + $0x20] sm:$0xff]  }
 0x59a   :  { %v631_v28 = vpop.f32.mrb[8].mxu0 }
 0x59b   :  { %v2236_v29 = vpop.f32.mrb[9].mxu0 }
 0x59c   :  { %v634_v30 = vpop.f32.mrb[10].mxu0  ;;  %v2446_v29 = vld [vmem:[%s2034_s5 + $0x30] sm:$0xff]  }
 0x59d   :  { %v2237_v31 = vpop.f32.mrb[11].mxu0  ;;  %v2447_v30 = vld [vmem:[%s2034_s5 + $0x38] sm:$0xff]  }
 0x59e   :  { %v2073_v31 = vld [vmem:[%s2033_s9] ss:$0 sm:$0xff]  ;;  %s2048_s9 = sld [smem:[%s2941_s0 + %s2555_s6]]  }
 0x5c2   :  { %v743_v33 = vpop.f32.mrb[12].mxu0 }
 0x5c3   :  { %v2424_v34 = vpack.i.bf16 %v743_v33, %v509_v24  ;;  %v2248_v35 = vpop.f32.mrb[13].mxu0  ;;  %v2441_v24 = vld [vmem:[%s2034_s5 + $0x8] sm:$0xff]  }
 0x5c4   :  { %v746_v36 = vpop.f32.mrb[14].mxu0 }
 0x5c5   :  { %2425 = vrot.lane.b32.xlu0 %v2424_v34, %s2533_s1  ;;  %v2249_v37 = vpop.f32.mrb[15].mxu0 }
 0x637   :  { %v2426_v38 = vpop.permute.xlu0 %2425 }
 0x638   :  { %v2428_v40 = vunpack.i.h.bf16 %v2426_v38  ;;  %v2427_v41 = vunpack.i.l.bf16 %v2426_v38 }
 0x63a   :  { %v753_v43 = vsel %vm292_vm2, %v631_v28, %v2428_v40  ;;  %v519_v44 = vsel %vm292_vm2, %v397_v20, %v2427_v41  ;;  %v2445_v28 = vld [vmem:[%s2034_s5 + $0x28] sm:$0xff]   ;;  %s2051_s5 = sld [smem:[%s2941_s0 + %s2554_s2]]  }
 0x63b   :  { %v754_v45 = vpack.c.bf16 %v753_v43, %v519_v44 }
 0x63d   :  { %2255 = vmatmul.mubr.msk.bf16.vlgmr.msra.gmra.mrb[20].mxu1 %vm174_vm0, %v754_v45 }
 0x63e   :  { %2282 = vmatprep.mubr.msk.bf16.mxu1 %vm2522_vm1, %v2521_v15  ;;  %2267 = vmatpush3.bf16.msra.mxu1 %v2440_v23 }
 0x63f   :  { %2268 = vmatprep.subr.bf16.mxu1 %v2521_v15 }
 0x642   :  { %2269 = vmatpush3.bf16.msra.mxu1 %v2441_v24 }
 0x643   :  { %2270 = vmatprep.subr.bf16.mxu1 %v2521_v15 }
 0x646   :  { %2271 = vmatpush3.bf16.msra.mxu1 %v2442_v25 }
 0x647   :  { %2272 = vmatprep.subr.bf16.mxu1 %v2521_v15 }
 0x64a   :  { %2273 = vmatpush3.bf16.msra.mxu1 %v2443_v26  ;;  %v2086_v26 = vld [vmem:[%s2036_s17] ss:$0 sm:$0xff]  ;;  %s2052_s17 = sld [smem:[%s2941_s0 + %s2557_s14]]  }
 0x64b   :  { %2274 = vmatprep.subr.bf16.mxu1 %v2521_v15 }
 0x64e   :  { %2275 = vmatpush3.bf16.msra.mxu1 %v2444_v27 }
 0x64f   :  { %2276 = vmatprep.subr.bf16.mxu1 %v2521_v15 }
 0x652   :  { %2277 = vmatpush3.bf16.msra.mxu1 %v2445_v28 }
 0x653   :  { %2278 = vmatprep.subr.bf16.mxu1 %v2521_v15 }
 0x656   :  { %2279 = vmatpush3.bf16.msra.mxu1 %v2446_v29 }
 0x657   :  { %2280 = vmatprep.subr.bf16.mxu1 %v2521_v15 }
 0x65a   :  { %2281 = vmatpush3.bf16.msra.mxu1 %v2447_v30 }
 0x65b   :  { %2312 = vmatprep.subr.bf16.mxu1 %v2521_v15 }
 0x710   :  { %v810_v47 = vpop.f32.mrb[20].mxu1 }
 0x711   :  { %v811_v48 = vadd.f32 %v2067_v46, %v810_v47  ;;  %v2256_v49 = vpop.f32.mrb[21].mxu1 }
 0x712   :  { %v813_v50 = vpop.f32.mrb[22].mxu1 }
 0x713   :  { %v2707_v51 = vadd.f32 %v811_v48, %v2566_v0  ;;  %v814_v52 = vadd.f32 %v2067_v46, %v813_v50  ;;  %v2257_v53 = vpop.f32.mrb[23].mxu1 }
 0x715   :  { %v2710_v54 = vadd.f32 %v814_v52, %v2568_v1  ;;  %v819_v55 = vsel %vm174_vm0, %v2707_v51, 0.0 }
 0x716   :  { %820 = vadd.xlane.f32.xlu1 %v819_v55 }
 0x717   :  { %v822_v56 = vsel %vm174_vm0, %v2710_v54, 0.0 }
 0x718   :  { %823 = vadd.xlane.f32.xlu0 %v822_v56 }
 0x7a3   :  { %v821_v57 = vpop.xlane.xlu1 %820 }
 0x7a4   :  { %v825_v58 = vmul.f32 0.03125, %v821_v57 }
 0x7a5   :  { %v824_v59 = vpop.xlane.xlu0 %823 }
 0x7a6   :  { %v827_v60 = vsub.f32 %v2707_v51, %v825_v58  ;;  %v826_v0 = vmul.f32 0.03125, %v824_v59 }
 0x7a8   :  { %v828_v39 = vsub.f32 %v2710_v54, %v826_v0  ;;  %v829_v61 = vmul.f32 %v827_v60, %v827_v60  ;;  %v2077_v0 = vld [vmem:[%s2035_s13] ss:$0 sm:$0xff]  ;;  %s2049_s13 = sld [smem:[%s2941_s0 + %s2556_s10]]  }
 0x7aa   :  { %v831_v1 = vsel %vm174_vm0, %v829_v61, 0.0  ;;  %v830_v62 = vmul.f32 %v828_v39, %v828_v39 }
 0x7ab   :  { %832 = vadd.xlane.f32.xlu0 %v831_v1 }
 0x7ac   :  { %v834_v2 = vsel %vm174_vm0, %v830_v62, 0.0 }
 0x7af   :  { %835 = vadd.xlane.f32.xlu0 %v834_v2 }
 0x838   :  { %v833_v4 = vpop.xlane.xlu0 %832 }
 0x839   :  { %v837_v5 = vmul.f32 0.03125, %v833_v4 }
 0x83b   :  { %v839_v6 = vadd.f32 1e-05, %v837_v5 }
 0x83c   :  { %v836_v7 = vpop.xlane.xlu0 %835 }
 0x83d   :  { %2482 = vrsqrt.f32 %v839_v6  ;;  %v838_v8 = vmul.f32 0.03125, %v836_v7 }
 0x83f   :  { %v840_v9 = vadd.f32 1e-05, %v838_v8 }
 0x841   :  { %2484 = vrsqrt.f32 %v840_v9 }
 0x847   :  { %v2483_v10 = vpop.eup %2482 }
 0x848   :  { %v843_v11 = vmul.f32 %v2483_v10, %v827_v60 }
 0x84a   :  { %v851_v14 = vmul.f32 %v2071_v12, %v843_v11 }
 0x84b   :  { %v2485_v13 = vpop.eup %2484 }
 0x84c   :  { %v844_v16 = vmul.f32 %v2485_v13, %v828_v39  ;;  %v859_v20 = vadd.f32 %v2072_v17, %v851_v14 }
 0x84e   :  { %v852_v18 = vmul.f32 %v2071_v12, %v844_v16  ;;  %v2448_v16 = vld [vmem:[%s2690_s4] sm:$0xff]  }
 0x850   :  { %v860_v21 = vadd.f32 %v2072_v17, %v852_v18  ;;  %v2449_v17 = vld [vmem:[%s2690_s4 + $0x8] sm:$0xff]   ;;  %s2046_s4 = sld [smem:[%s2941_s0 + %s2550_s16]]  }
 0x852   :  { %v861_v22 = vpack.c.bf16 %v860_v21, %v859_v20 }
 0x854   :  { %2263 = vmatmul.mubr.msk.bf16.vlgmr.msra.gmra.mrb[16].mxu0 %vm174_vm0, %v861_v22 }
 0x855   :  { %2290 = vmatprep.mubr.msk.bf16.mxu0 %vm2522_vm1, %v2521_v15  ;;  %2287 = vmatpush3.bf16.msra.mxu0 %v2448_v16 }
 0x856   :  { %2288 = vmatprep.subr.bf16.mxu0 %v2521_v15 }
 0x859   :  { %2289 = vmatpush3.bf16.msra.mxu0 %v2449_v17 }
 0x85a   :  { %2294 = vmatprep.subr.bf16.mxu0 %v2521_v15 }
 0x927   :  { %v917_v32 = vpop.f32.mrb[16].mxu0 }
 0x928   :  { %v918_v33 = vadd.f32 %v2073_v31, %v917_v32  ;;  %v2264_v34 = vpop.f32.mrb[17].mxu0 }
 0x929   :  { %v920_v35 = vpop.f32.mrb[18].mxu0 }
 0x92a   :  { %v926_v36 = vmul.f32 0.044715, %v918_v33  ;;  %v921_v37 = vadd.f32 %v2073_v31, %v920_v35  ;;  %v2265_v38 = vpop.f32.mrb[19].mxu0  ;;  %v924_v55 = vmul.f32 0.5, %v918_v33  ;;  %v2087_v31 = vld [vmem:[%s2037_s20] ss:$0 sm:$0xff] }
 0x92c   :  { %v928_v40 = vmul.f32 %v926_v36, %v918_v33  ;;  %v927_v41 = vmul.f32 0.044715, %v921_v37  ;;  %v925_v56 = vmul.f32 0.5, %v921_v37  ;;  %v2088_v36 = vld [vmem:[%s2039_s27] ss:$0 sm:$0xff] }
 0x92e   :  { %v930_v43 = vmul.f32 %v928_v40, %v918_v33  ;;  %v929_v44 = vmul.f32 %v927_v41, %v921_v37 }
 0x930   :  { %v932_v45 = vadd.f32 %v930_v43, %v918_v33  ;;  %v931_v46 = vmul.f32 %v929_v44, %v921_v37 }
 0x932   :  { %v934_v47 = vmul.f32 0.7978846, %v932_v45  ;;  %v933_v48 = vadd.f32 %v931_v46, %v921_v37 }
 0x934   :  { %2486 = vtanh.f32 %v934_v47  ;;  %v935_v49 = vmul.f32 0.7978846, %v933_v48 }
 0x936   :  { %2488 = vtanh.f32 %v935_v49 }
 0x93e   :  { %v2487_v50 = vpop.eup %2486 }
 0x93f   :  { %v938_v52 = vadd.f32 1.0, %v2487_v50 }
 0x940   :  { %v2489_v53 = vpop.eup %2488 }
 0x941   :  { %v939_v57 = vadd.f32 1.0, %v2489_v53  ;;  %v940_v58 = vmul.f32 %v938_v52, %v924_v55 }
 0x943   :  { %v941_v59 = vmul.f32 %v939_v57, %v925_v56 }
 0x945   :  { %v942_v60 = vpack.c.bf16 %v941_v59, %v940_v58 }
 0x947   :  { %2283 = vmatmul.mubr.bf16.vlgmr.msra.gmra.mrb[24].mxu1 %v942_v60 }
 0x948   :  { %2314 = vmatprep.mubr.msk.bf16.mxu1 %vm2522_vm1, %v2521_v15 }
 0xa1a   :  { %v1031_v39 = vpop.f32.mrb[24].mxu1 }
 0xa1b   :  { %v1032_v61 = vadd.f32 %v2077_v0, %v1031_v39  ;;  %v2284_v1 = vpop.f32.mrb[25].mxu1 }
 0xa1c   :  { %v1034_v62 = vpop.f32.mrb[26].mxu1 }
 0xa1d   :  { %v2754_v2 = vadd.f32 %v1032_v61, %v2707_v51  ;;  %v1035_v3 = vadd.f32 %v2077_v0, %v1034_v62  ;;  %v2285_v42 = vpop.f32.mrb[27].mxu1 }
 0xa1f   :  { %v2757_v4 = vadd.f32 %v1035_v3, %v2710_v54  ;;  %v1076_v5 = vsel %vm174_vm0, %v2754_v2, 0.0 }
 0xa20   :  { %1077 = vadd.xlane.f32.xlu1 %v1076_v5 }
 0xa21   :  { %v1079_v6 = vsel %vm174_vm0, %v2757_v4, 0.0 }
 0xa22   :  { %1080 = vadd.xlane.f32.xlu0 %v1079_v6 }
 0xaad   :  { %v1078_v7 = vpop.xlane.xlu1 %1077 }
 0xaae   :  { %v1082_v8 = vmul.f32 0.03125, %v1078_v7 }
 0xaaf   :  { %v1081_v9 = vpop.xlane.xlu0 %1080 }
 0xab0   :  { %v1084_v51 = vsub.f32 %v2754_v2, %v1082_v8  ;;  %v1083_v10 = vmul.f32 0.03125, %v1081_v9 }
 0xab2   :  { %v1085_v11 = vsub.f32 %v2757_v4, %v1083_v10  ;;  %v1086_v54 = vmul.f32 %v1084_v51, %v1084_v51 }
 0xab4   :  { %v1088_v12 = vsel %vm174_vm0, %v1086_v54, 0.0  ;;  %v1087_v13 = vmul.f32 %v1085_v11, %v1085_v11 }
 0xab5   :  { %1089 = vadd.xlane.f32.xlu1 %v1088_v12 }
 0xab6   :  { %v1091_v14 = vsel %vm174_vm0, %v1087_v13, 0.0 }
 0xab7   :  { %1092 = vadd.xlane.f32.xlu0 %v1091_v14 }
 0xb42   :  { %v1090_v18 = vpop.xlane.xlu1 %1089 }
 0xb43   :  { %v1094_v20 = vmul.f32 0.03125, %v1090_v18 }
 0xb44   :  { %v1093_v21 = vpop.xlane.xlu0 %1092 }
 0xb45   :  { %v1096_v22 = vadd.f32 1e-05, %v1094_v20  ;;  %v1095_v23 = vmul.f32 0.03125, %v1093_v21 }
 0xb47   :  { %2490 = vrsqrt.f32 %v1096_v22  ;;  %v1097_v24 = vadd.f32 1e-05, %v1095_v23 }
 0xb49   :  { %2492 = vrsqrt.f32 %v1097_v24 }
 0xb51   :  { %v2491_v25 = vpop.eup %2490 }
 0xb52   :  { %v1100_v27 = vmul.f32 %v2491_v25, %v1084_v51 }
 0xb53   :  { %v2493_v28 = vpop.eup %2492 }
 0xb54   :  { %v1108_v29 = vmul.f32 %v2086_v26, %v1100_v27  ;;  %v1101_v30 = vmul.f32 %v2493_v28, %v1085_v11 }
 0xb56   :  { %v1109_v32 = vmul.f32 %v2086_v26, %v1101_v30  ;;  %v1116_v33 = vadd.f32 %v2087_v31, %v1108_v29 }
 0xb58   :  { %v1117_v34 = vadd.f32 %v2087_v31, %v1109_v32 }
 0xb5a   :  { %v1118_v35 = vpack.c.bf16 %v1117_v34, %v1116_v33 }
 0xb5c   :  { %2291 = vmatmul.mubr.msk.bf16.vlgmr.msra.gmra.mrb[20].mxu0 %vm174_vm0, %v1118_v35 }
 0xb5d   :  { %2296 = vmatprep.mubr.msk.bf16.mxu0 %vm2522_vm1, %v2521_v15 }
 0xc2f   :  { %v1174_v37 = vpop.f32.mrb[20].mxu0 }
 0xc30   :  { %v1175_v38 = vadd.f32 %v2088_v36, %v1174_v37  ;;  %v2292_v40 = vpop.f32.mrb[21].mxu0 }
 0xc31   :  { %v1177_v41 = vpop.f32.mrb[22].mxu0 }
 0xc32   :  { %v2783_v43 = vpack.c.bf16 %v1175_v38, %v1175_v38  ;;  %v2293_v44 = vpop.f32.mrb[23].mxu0  ;;  %v1178_v45 = vadd.f32 %v2088_v36, %v1177_v41 }
 0xc34   :  { %1183 = vrot.lane.b32.xlu1 %v2783_v43, %s2527_s23  ;;  %v2791_v46 = vpack.c.bf16 %v1178_v45, %v1178_v45 }
 0xc38   :  { %1295 = vrot.lane.b32.xlu1 %v2783_v43, %s2526_s22 }
 0xc3c   :  { %1293 = vrot.lane.b32.xlu1 %v2783_v43, %s2528_s24 }
 0xc40   :  { %1412 = vrot.lane.b32.xlu1 %v2791_v46, %s2527_s23  ;;  %s2047_s23 = sld [smem:[%s2941_s0 + %s2552_s26]]  }
 0xc44   :  { %1524 = vrot.lane.b32.xlu1 %v2791_v46, %s2526_s22  ;;  %s2545_s22 = smov 18  }
 0xc48   :  { %1522 = vrot.lane.b32.xlu1 %v2791_v46, %s2528_s24  ;;  %s2553_s24 = smov 28  }
 0xc49   :  { %s2050_s28 = sld [smem:[%s2941_s0 + %s2553_s24]]  }
 0xca6   :  { %v1184_v47 = vpop.permute.xlu1 %1183 }
 0xca7   :  { %v1189_v48 = vsel %vm292_vm2, %v1184_v47, 0 }
 0xca8   :  { %2295 = vmatpush3.bf16.xpose.msra.mxu0 %v1189_v48 }
 0xca9   :  { %2300 = vmatprep.subr.bf16.mxu0 %v2521_v15 }
 0xcaa   :  { %v1296_v3 = vpop.permute.xlu1 %1295 }
 0xcab   :  { %v1301_v8 = vsel %vm292_vm2, %v1296_v3, 0 }
 0xcae   :  { %v1294_v7 = vpop.permute.xlu1 %1293 }
 0xcaf   :  { %2297 = vmatmul.mubr.msk.bf16.vlgmr.msra.gmra.mrb[24].mxu0 %vm292_vm2, %v2783_v43 }
 0xcb0   :  { %2302 = vmatprep.mubr.msk.bf16.mxu0 %vm2522_vm1, %v2521_v15 }
 0xcb2   :  { %v1413_v9 = vpop.permute.xlu1 %1412 }
 0xcb3   :  { %v1418_v51 = vsel %vm292_vm2, %v1413_v9, 0 }
 0xcb6   :  { %v1525_v10 = vpop.permute.xlu1 %1524 }
 0xcb7   :  { %v1530_v11 = vsel %vm292_vm2, %v1525_v10, 0 }
 0xcba   :  { %v1523_v54 = vpop.permute.xlu1 %1522 }
 0xd82   :  { %v1225_v49 = vpop.f32.mrb[24].mxu0 }
 0xd83   :  { %v1231_v50 = vmul.f32 0.25, %v1225_v49  ;;  %v2298_v52 = vpop.f32.mrb[25].mxu0 }
 0xd84   :  { %v1228_v53 = vpop.f32.mrb[26].mxu0 }
 0xd85   :  { %v2299_v55 = vpop.f32.mrb[27].mxu0  ;;  %v1232_v56 = vadd.f32 %v1231_v50, %v2642_v63 }
 0xd87   :  { %v1233_v57 = vsel %vm341_vm4, %v1232_v56, -inf }
 0xd88   :  { %1234 = vmax.xlane.f32.xlu0 %v1233_v57 }
 0xe15   :  { %v1235_v58 = vpop.xlane.xlu0 %1234 }
 0xe16   :  { %v1236_v59 = vsub.f32 %v1232_v56, %v1235_v58 }
 0xe18   :  { %v1237_v60 = vmul.f32 1.442695, %v1236_v59 }
 0xe1a   :  { %2494 = vpow2.f32 %v1237_v60 }
 0xe24   :  { %v2495_v0 = vpop.eup %2494 }
 0xe25   :  { %v1239_v39 = vsel %vm341_vm4, %v2495_v0, 0.0 }
 0xe26   :  { %1240 = vadd.xlane.f32.xlu0 %v1239_v39 }
 0xe3c   :  { %1245 = vrot.lane.b32.xlu0 %v2783_v43, %s2532_s30 }
 0xeb3   :  { %v1241_v61 = vpop.xlane.xlu0 %1240 }
 0xeb4   :  { %2496 = vrcp.f32 %v1241_v61 }
 0xeb7   :  { %v1246_v1 = vpop.permute.xlu0 %1245 }
 0xeb8   :  { %v1251_v62 = vsel %vm359_vm5, %v1246_v1, 0 }
 0xeb9   :  { %2301 = vmatpush3.bf16.msra.mxu0 %v1251_v62 }
 0xeba   :  { %2306 = vmatprep.subr.bf16.mxu0 %v2521_v15 }
 0xebe   :  { %v2497_v42 = vpop.eup %2496 }
 0xebf   :  { %v1243_v5 = vmul.f32 %v2497_v42, %v2495_v0 }
 0xec1   :  { %v1244_v6 = vpack.c.bf16 %v1243_v5, %v1243_v5 }
 0xec3   :  { %2303 = vmatmul.mubr.msk.bf16.vlgmr.msra.gmra.mrb[28].mxu0 %vm341_vm4, %v1244_v6 }
 0xec4   :  { %2307 = vmatpush3.bf16.xpose.msra.mxu0 %v1301_v8  ;;  %2308 = vmatprep.mubr.msk.bf16.mxu0 %vm2522_vm1, %v2521_v15 }
 0xec5   :  { %2318 = vmatprep.subr.bf16.mxu0 %v2521_v15 }
 0xecb   :  { %2309 = vmatmul.mubr.msk.bf16.vlgmr.msra.gmra.mrb[32].mxu0 %vm292_vm2, %v1294_v7 }
 0xecc   :  { %2319 = vmatpush3.bf16.xpose.msra.mxu0 %v1418_v51  ;;  %2320 = vmatprep.mubr.msk.bf16.mxu0 %vm2522_vm1, %v2521_v15 }
 0xecd   :  { %2330 = vmatprep.subr.bf16.mxu0 %v2521_v15 }
 0xed3   :  { %2321 = vmatmul.mubr.msk.bf16.vlgmr.msra.gmra.mrb[36].mxu0 %vm292_vm2, %v2791_v46 }
 0xed4   :  { %2331 = vmatpush3.bf16.xpose.msra.mxu0 %v1530_v11  ;;  %2332 = vmatprep.mubr.msk.bf16.mxu0 %vm2522_vm1, %v2521_v15 }
 0xed5   :  { %2342 = vmatprep.subr.bf16.mxu0 %v2521_v15 }
 0xedb   :  { %2333 = vmatmul.mubr.msk.bf16.vlgmr.msra.gmra.mrb[40].mxu0 %vm292_vm2, %v1523_v54 }
 0xedc   :  { %2346 = vmatprep.mubr.msk.bf16.mxu0 %vm2522_vm1, %v2521_v15 }
 0xf96   :  { %v2831_v12 = vpop.f32.mrb[28].mxu0 }
 0xf97   :  { %v2304_v13 = vpop.f32.mrb[29].mxu0 }
 0xf98   :  { %v1290_v14 = vpop.f32.mrb[30].mxu0 }
 0xf99   :  { %v2305_v16 = vpop.f32.mrb[31].mxu0 }
 0xf9e   :  { %v1337_v17 = vpop.f32.mrb[32].mxu0 }
 0xf9f   :  { %v1343_v18 = vmul.f32 0.25, %v1337_v17  ;;  %v2310_v20 = vpop.f32.mrb[33].mxu0 }
 0xfa0   :  { %v1340_v21 = vpop.f32.mrb[34].mxu0 }
 0xfa1   :  { %v2311_v22 = vpop.f32.mrb[35].mxu0  ;;  %v1344_v23 = vadd.f32 %v1343_v18, %v2642_v63 }
 0xfa3   :  { %v1345_v24 = vsel %vm341_vm4, %v1344_v23, -inf }
 0xfa4   :  { %1346 = vmax.xlane.f32.xlu0 %v1345_v24 }
 0xfa6   :  { %v1454_v25 = vpop.f32.mrb[36].mxu0 }
 0xfa7   :  { %v1460_v26 = vmul.f32 0.25, %v1454_v25  ;;  %v2322_v27 = vpop.f32.mrb[37].mxu0 }
 0xfa8   :  { %v1457_v28 = vpop.f32.mrb[38].mxu0 }
 0xfa9   :  { %v2323_v29 = vpop.f32.mrb[39].mxu0  ;;  %v1461_v30 = vadd.f32 %v1460_v26, %v2648_v19 }
 0xfab   :  { %v1462_v31 = vsel %vm341_vm4, %v1461_v30, -inf }
 0xfac   :  { %1463 = vmax.xlane.f32.xlu1 %v1462_v31 }
 0xfae   :  { %v1566_v32 = vpop.f32.mrb[40].mxu0 }
 0xfaf   :  { %v1572_v33 = vmul.f32 0.25, %v1566_v32  ;;  %v2334_v34 = vpop.f32.mrb[41].mxu0 }
 0xfb0   :  { %v1569_v35 = vpop.f32.mrb[42].mxu0 }
 0xfb1   :  { %v2335_v36 = vpop.f32.mrb[43].mxu0  ;;  %v1573_v63 = vadd.f32 %v1572_v33, %v2648_v19 }
 0xfb3   :  { %v1574_v37 = vsel %vm341_vm4, %v1573_v63, -inf }
 0xfb4   :  { %1575 = vmax.xlane.f32.xlu0 %v1574_v37 }
 0xfbd   :  { %1474 = vrot.lane.b32.xlu1 %v2791_v46, %s2532_s30  ;;  %s2546_s30 = smov 19  }
0x1031   :  { %v1347_v38 = vpop.xlane.xlu0 %1346 }
0x1032   :  { %v1348_v40 = vsub.f32 %v1344_v23, %v1347_v38 }
0x1034   :  { %v1349_v41 = vmul.f32 1.442695, %v1348_v40 }
0x1036   :  { %2498 = vpow2.f32 %v1349_v41 }
0x1039   :  { %v1464_v44 = vpop.xlane.xlu1 %1463 }
0x103a   :  { %v1465_v45 = vsub.f32 %v1461_v30, %v1464_v44 }
0x103c   :  { %v1466_v47 = vmul.f32 1.442695, %v1465_v45 }
0x103d   :  { %v1475_v0 = vpop.permute.xlu1 %1474 }
0x103e   :  { %2500 = vpow2.f32 %v1466_v47 }
0x1040   :  { %v2499_v48 = vpop.eup %2498 }
0x1041   :  { %v1576_v49 = vpop.xlane.xlu0 %1575  ;;  %v1351_v50 = vsel %vm341_vm4, %v2499_v48, 0.0 }
0x1042   :  { %v1577_v52 = vsub.f32 %v1573_v63, %v1576_v49  ;;  %1352 = vadd.xlane.f32.xlu0 %v1351_v50 }
0x1044   :  { %v1578_v19 = vmul.f32 1.442695, %v1577_v52 }
0x1046   :  { %2502 = vpow2.f32 %v1578_v19 }
0x1048   :  { %v2501_v53 = vpop.eup %2500 }
0x1049   :  { %v1468_v55 = vsel %vm341_vm4, %v2501_v53, 0.0 }
0x104a   :  { %1469 = vadd.xlane.f32.xlu0 %v1468_v55  ;;  %v2452_v55 = vld [vmem:[%s2044_s7] sm:$0xff]  }
0x1050   :  { %v2503_v56 = vpop.eup %2502 }
0x1051   :  { %v1580_v57 = vsel %vm341_vm4, %v2503_v56, 0.0 }
0x1052   :  { %1581 = vadd.xlane.f32.xlu1 %v1580_v57 }
0x1060   :  { %1357 = vrot.lane.b32.xlu0 %v2783_v43, %s2531_s29  ;;  %v1480_v43 = vsel %vm359_vm5, %v1475_v0, 0 }
0x1063   :  { %1586 = vrot.lane.b32.xlu1 %v2791_v46, %s2531_s29  ;;  %s2040_s29 = sld [smem:[%s2941_s0 + %s2545_s22]]  }
0x1069   :  { %v2450_v10 = vld [vmem:[%s2040_s29] sm:$0xff]   ;;  %v2451_v16 = vld [vmem:[%s2040_s29 + $0x8] sm:$0xff]  }
0x106a   :  { %2343 = vmatpush3.bf16.msra.mxu0 %v2450_v10  ;;  %v2456_v10 = vld [vmem:[%s2046_s4 + $0x10] sm:$0xff]  }
0x106b   :  { %2344 = vmatprep.subr.bf16.mxu0 %v2521_v15 }
0x106e   :  { %2345 = vmatpush3.bf16.msra.mxu0 %v2451_v16  ;;  %v2461_v16 = vld [vmem:[%s2046_s4 + $0x38] sm:$0xff]  }
0x106f   :  { %2358 = vmatprep.subr.bf16.mxu0 %v2521_v15 }
0x10cf   :  { %v1353_v58 = vpop.xlane.xlu0 %1352 }
0x10d0   :  { %2504 = vrcp.f32 %v1353_v58 }
0x10d7   :  { %v1470_v59 = vpop.xlane.xlu0 %1469 }
0x10d8   :  { %2506 = vrcp.f32 %v1470_v59 }
0x10da   :  { %v2505_v60 = vpop.eup %2504 }
0x10db   :  { %v1355_v39 = vmul.f32 %v2505_v60, %v2499_v48  ;;  %v1358_v61 = vpop.permute.xlu0 %1357 }
0x10dc   :  { %v1363_v1 = vsel %vm359_vm5, %v1358_v61, 0 }
0x10dd   :  { %2313 = vmatpush3.bf16.msra.mxu1 %v1363_v1  ;;  %v1356_v62 = vpack.c.bf16 %v1355_v39, %v1355_v39 }
0x10de   :  { %2324 = vmatprep.subr.bf16.mxu1 %v2521_v15 }
0x10df   :  { %v1582_v3 = vpop.xlane.xlu1 %1581 }
0x10e0   :  { %2508 = vrcp.f32 %v1582_v3  ;;  %2315 = vmatmul.mubr.msk.bf16.vlgmr.msra.gmra.mrb[28].mxu1 %vm341_vm4, %v1356_v62  ;;  %v2104_v62 = vld [vmem:[%s2042_s11] ss:$0 sm:$0xff] }
0x10e1   :  { %2325 = vmatpush3.bf16.msra.mxu1 %v1480_v43  ;;  %2326 = vmatprep.mubr.msk.bf16.mxu1 %vm2522_vm1, %v2521_v15 }
0x10e2   :  { %v2507_v46 = vpop.eup %2506  ;;  %2336 = vmatprep.subr.bf16.mxu1 %v2521_v15 }
0x10e3   :  { %v1472_v42 = vmul.f32 %v2507_v46, %v2501_v53  ;;  %v1587_v5 = vpop.permute.xlu1 %1586 }
0x10e4   :  { %v1592_v7 = vsel %vm359_vm5, %v1587_v5, 0 }
0x10e5   :  { %v1473_v6 = vpack.c.bf16 %v1472_v42, %v1472_v42  ;;  %v2105_v42 = vld [vmem:[%s2043_s15] ss:$0 sm:$0xff] }
0x10e8   :  { %2327 = vmatmul.mubr.msk.bf16.vlgmr.msra.gmra.mrb[32].mxu1 %vm341_vm4, %v1473_v6 }
0x10e9   :  { %2337 = vmatpush3.bf16.msra.mxu1 %v1592_v7  ;;  %2338 = vmatprep.mubr.msk.bf16.mxu1 %vm2522_vm1, %v2521_v15 }
0x10ea   :  { %v2509_v8 = vpop.eup %2508  ;;  %2350 = vmatprep.subr.bf16.mxu1 %v2521_v15 }
0x10eb   :  { %v1584_v9 = vmul.f32 %v2509_v8, %v2503_v56  ;;  %v2453_v56 = vld [vmem:[%s2044_s7 + $0x8] sm:$0xff]  }
0x10ed   :  { %v1585_v51 = vpack.c.bf16 %v1584_v9, %v1584_v9  ;;  %v2454_v9 = vld [vmem:[%s2046_s4] sm:$0xff]  }
0x10f0   :  { %2339 = vmatmul.mubr.msk.bf16.vlgmr.msra.gmra.mrb[36].mxu1 %vm341_vm4, %v1585_v51  ;;  %v2455_v51 = vld [vmem:[%s2046_s4 + $0x8] sm:$0xff]  }
0x10f1   :  { %2354 = vmatprep.mubr.msk.bf16.mxu1 %vm2522_vm1, %v2521_v15  ;;  %2351 = vmatpush3.bf16.msra.mxu1 %v2452_v55 }
0x10f2   :  { %2352 = vmatprep.subr.bf16.mxu1 %v2521_v15 }
0x10f5   :  { %2353 = vmatpush3.bf16.msra.mxu1 %v2453_v56 }
0x10f6   :  { %2378 = vmatprep.subr.bf16.mxu1 %v2521_v15 }
0x11b3   :  { %v1399_v11 = vpop.f32.mrb[28].mxu1 }
0x11b4   :  { %v2316_v54 = vpop.f32.mrb[29].mxu1 }
0x11b5   :  { %v1402_v13 = vpop.f32.mrb[30].mxu1  ;;  %v2458_v54 = vld [vmem:[%s2046_s4 + $0x20] sm:$0xff]  }
0x11b6   :  { %v2317_v14 = vpop.f32.mrb[31].mxu1  ;;  %v2459_v13 = vld [vmem:[%s2046_s4 + $0x28] sm:$0xff]  }
0x11b7   :  { %v2460_v14 = vld [vmem:[%s2046_s4 + $0x30] sm:$0xff]  }
0x11bb   :  { %v1516_v17 = vpop.f32.mrb[32].mxu1 }
0x11bc   :  { %v2328_v18 = vpop.f32.mrb[33].mxu1 }
0x11bd   :  { %v1519_v20 = vpop.f32.mrb[34].mxu1 }
0x11be   :  { %v2329_v21 = vpop.f32.mrb[35].mxu1 }
0x11c3   :  { %v1628_v22 = vpop.f32.mrb[36].mxu1 }
0x11c4   :  { %v2429_v23 = vpack.i.bf16 %v1628_v22, %v1399_v11  ;;  %v2340_v24 = vpop.f32.mrb[37].mxu1  ;;  %v2457_v11 = vld [vmem:[%s2046_s4 + $0x18] sm:$0xff]  }
0x11c5   :  { %v1631_v25 = vpop.f32.mrb[38].mxu1 }
0x11c6   :  { %2430 = vrot.lane.b32.xlu1 %v2429_v23, %s2533_s1  ;;  %v2341_v26 = vpop.f32.mrb[39].mxu1  ;;  %s2041_s1 = sld [smem:[%s2941_s0 + %s2546_s30]]  }
0x11cc   :  { %v2100_v33 = vld [vmem:[%s2041_s1] ss:$0 sm:$0xff] }
0x1238   :  { %v2431_v27 = vpop.permute.xlu1 %2430 }
0x1239   :  { %v2433_v28 = vunpack.i.h.bf16 %v2431_v27  ;;  %v2432_v29 = vunpack.i.l.bf16 %v2431_v27 }
0x123b   :  { %v1638_v30 = vsel %vm292_vm2, %v1516_v17, %v2433_v28  ;;  %v1409_v31 = vsel %vm292_vm2, %v2831_v12, %v2432_v29  ;;  %v2106_v17 = vld [vmem:[%s2045_s25] ss:$0 sm:$0xff] }
0x123c   :  { %v1639_v32 = vpack.c.bf16 %v1638_v30, %v1409_v31 }
0x123e   :  { %2347 = vmatmul.mubr.msk.bf16.vlgmr.msra.gmra.mrb[44].mxu0 %vm174_vm0, %v1639_v32 }
0x123f   :  { %2374 = vmatprep.mubr.msk.bf16.mxu0 %vm2522_vm1, %v2521_v15  ;;  %2359 = vmatpush3.bf16.msra.mxu0 %v2454_v9  ;;  %v2120_v9 = vld [vmem:[%s2049_s13] ss:$0 sm:$0xff] }
0x1240   :  { %2360 = vmatprep.subr.bf16.mxu0 %v2521_v15 }
0x1243   :  { %2361 = vmatpush3.bf16.msra.mxu0 %v2455_v51 }
0x1244   :  { %2362 = vmatprep.subr.bf16.mxu0 %v2521_v15 }
0x1247   :  { %2363 = vmatpush3.bf16.msra.mxu0 %v2456_v10 }
0x1248   :  { %2364 = vmatprep.subr.bf16.mxu0 %v2521_v15 }
0x124b   :  { %2365 = vmatpush3.bf16.msra.mxu0 %v2457_v11 }
0x124c   :  { %2366 = vmatprep.subr.bf16.mxu0 %v2521_v15 }
0x124f   :  { %2367 = vmatpush3.bf16.msra.mxu0 %v2458_v54 }
0x1250   :  { %2368 = vmatprep.subr.bf16.mxu0 %v2521_v15 }
0x1253   :  { %2369 = vmatpush3.bf16.msra.mxu0 %v2459_v13 }
0x1254   :  { %2370 = vmatprep.subr.bf16.mxu0 %v2521_v15 }
0x1257   :  { %2371 = vmatpush3.bf16.msra.mxu0 %v2460_v14 }
0x1258   :  { %2372 = vmatprep.subr.bf16.mxu0 %v2521_v15 }
0x125b   :  { %2373 = vmatpush3.bf16.msra.mxu0 %v2461_v16 }
0x1311   :  { %v1695_v34 = vpop.f32.mrb[44].mxu0 }
0x1312   :  { %v1696_v35 = vadd.f32 %v2100_v33, %v1695_v34  ;;  %v2348_v36 = vpop.f32.mrb[45].mxu0 }
0x1313   :  { %v1698_v63 = vpop.f32.mrb[46].mxu0 }
0x1314   :  { %v2879_v37 = vadd.f32 %v1696_v35, %v2754_v2  ;;  %v1699_v12 = vadd.f32 %v2100_v33, %v1698_v63  ;;  %v2349_v38 = vpop.f32.mrb[47].mxu0 }
0x1316   :  { %v2882_v40 = vadd.f32 %v1699_v12, %v2757_v4  ;;  %v1704_v41 = vsel %vm174_vm0, %v2879_v37, 0.0 }
0x1317   :  { %1705 = vadd.xlane.f32.xlu0 %v1704_v41 }
0x1318   :  { %v1707_v44 = vsel %vm174_vm0, %v2882_v40, 0.0 }
0x1319   :  { %1708 = vadd.xlane.f32.xlu1 %v1707_v44 }
0x13a4   :  { %v1706_v45 = vpop.xlane.xlu0 %1705 }
0x13a5   :  { %v1710_v47 = vmul.f32 0.03125, %v1706_v45 }
0x13a6   :  { %v1709_v48 = vpop.xlane.xlu1 %1708 }
0x13a7   :  { %v1712_v49 = vsub.f32 %v2879_v37, %v1710_v47  ;;  %v1711_v2 = vmul.f32 0.03125, %v1709_v48  ;;  %v2110_v48 = vld [vmem:[%s2047_s23] ss:$0 sm:$0xff] }
0x13a9   :  { %v1713_v50 = vsub.f32 %v2882_v40, %v1711_v2  ;;  %v1714_v52 = vmul.f32 %v1712_v49, %v1712_v49 }
0x13ab   :  { %v1716_v4 = vsel %vm174_vm0, %v1714_v52, 0.0  ;;  %v1715_v19 = vmul.f32 %v1713_v50, %v1713_v50 }
0x13ac   :  { %1717 = vadd.xlane.f32.xlu0 %v1716_v4 }
0x13ad   :  { %v1719_v53 = vsel %vm174_vm0, %v1715_v19, 0.0 }
0x13b0   :  { %1720 = vadd.xlane.f32.xlu0 %v1719_v53 }
0x1439   :  { %v1718_v57 = vpop.xlane.xlu0 %1717 }
0x143a   :  { %v1722_v58 = vmul.f32 0.03125, %v1718_v57 }
0x143c   :  { %v1724_v59 = vadd.f32 1e-05, %v1722_v58 }
0x143d   :  { %v1721_v60 = vpop.xlane.xlu0 %1720 }
0x143e   :  { %2510 = vrsqrt.f32 %v1724_v59  ;;  %v1723_v0 = vmul.f32 0.03125, %v1721_v60 }
0x1440   :  { %v1725_v39 = vadd.f32 1e-05, %v1723_v0 }
0x1442   :  { %2512 = vrsqrt.f32 %v1725_v39 }
0x1448   :  { %v2511_v61 = vpop.eup %2510 }
0x1449   :  { %v1728_v1 = vmul.f32 %v2511_v61, %v1712_v49 }
0x144b   :  { %v1736_v43 = vmul.f32 %v2104_v62, %v1728_v1  ;;  %v1928_v1 = vld [vmem:[%s2050_s28 + $0x8] sm:$0xff] }
0x144c   :  { %v2513_v3 = vpop.eup %2512 }
0x144d   :  { %v1729_v46 = vmul.f32 %v2513_v3, %v1713_v50  ;;  %v1744_v6 = vadd.f32 %v2105_v42, %v1736_v43  ;;  %v1930_v3 = vld [vmem:[%s2050_s28 + $0x18] sm:$0xff] }
0x144f   :  { %v1737_v5 = vmul.f32 %v2104_v62, %v1729_v46  ;;  %v66_v46 = vstv %s2051_s5 }
0x1450   :  { %67 = vst [vmem:[#allocation2] sm:$0x1] %v66_v46 }
0x1451   :  { %v1745_v7 = vadd.f32 %v2105_v42, %v1737_v5 }
0x1453   :  { %v1746_v8 = vpack.c.bf16 %v1745_v7, %v1744_v6  ;;  %v2119_v7 = vld [vmem:[%s2048_s9] ss:$0 sm:$0xff] }
0x1455   :  { %2355 = vmatmul.mubr.msk.bf16.vlgmr.msra.gmra.mrb[40].mxu1 %vm174_vm0, %v1746_v8 }
0x1456   :  { %2382 = vmatprep.mubr.msk.bf16.mxu1 %vm2522_vm1, %v2521_v15 }
0x1457   :  { %v2121_v54 = vld [vmem:[#allocation2] ss:$0 sm:$0xff] }
0x1528   :  { %v1802_v18 = vpop.f32.mrb[40].mxu1 }
0x1529   :  { %v1803_v20 = vadd.f32 %v2106_v17, %v1802_v18  ;;  %v2356_v21 = vpop.f32.mrb[41].mxu1 }
0x152a   :  { %v1805_v22 = vpop.f32.mrb[42].mxu1 }
0x152b   :  { %v1811_v23 = vmul.f32 0.044715, %v1803_v20  ;;  %v1806_v24 = vadd.f32 %v2106_v17, %v1805_v22  ;;  %v2357_v25 = vpop.f32.mrb[43].mxu1  ;;  %v1809_v12 = vmul.f32 0.5, %v1803_v20 }
0x152d   :  { %v1813_v26 = vmul.f32 %v1811_v23, %v1803_v20  ;;  %v1812_v27 = vmul.f32 0.044715, %v1806_v24  ;;  %v1810_v38 = vmul.f32 0.5, %v1806_v24 }
0x152f   :  { %v1815_v28 = vmul.f32 %v1813_v26, %v1803_v20  ;;  %v1814_v29 = vmul.f32 %v1812_v27, %v1806_v24 }
0x1531   :  { %v1817_v30 = vadd.f32 %v1815_v28, %v1803_v20  ;;  %v1816_v31 = vmul.f32 %v1814_v29, %v1806_v24 }
0x1533   :  { %v1819_v32 = vmul.f32 0.7978846, %v1817_v30  ;;  %v1818_v33 = vadd.f32 %v1816_v31, %v1806_v24 }
0x1535   :  { %2514 = vtanh.f32 %v1819_v32  ;;  %v1820_v34 = vmul.f32 0.7978846, %v1818_v33 }
0x1537   :  { %2516 = vtanh.f32 %v1820_v34 }
0x153f   :  { %v2515_v35 = vpop.eup %2514 }
0x1540   :  { %v1823_v36 = vadd.f32 1.0, %v2515_v35 }
0x1541   :  { %v2517_v63 = vpop.eup %2516 }
0x1542   :  { %v1824_v41 = vadd.f32 1.0, %v2517_v63  ;;  %v1825_v44 = vmul.f32 %v1823_v36, %v1809_v12 }
0x1544   :  { %v1826_v45 = vmul.f32 %v1824_v41, %v1810_v38 }
0x1546   :  { %v1827_v47 = vpack.c.bf16 %v1826_v45, %v1825_v44 }
0x1548   :  { %2375 = vmatmul.mubr.bf16.vlgmr.msra.gmra.mrb[48].mxu0 %v1827_v47 }
0x161b   :  { %v1916_v49 = vpop.f32.mrb[48].mxu0 }
0x161c   :  { %v2376_v2 = vpop.f32.mrb[49].mxu0  ;;  %v1917_v52 = vadd.f32 %v2110_v48, %v1916_v49 }
0x161d   :  { %v1919_v50 = vpop.f32.mrb[50].mxu0 }
0x161e   :  { %v1920_v4 = vadd.f32 %v2110_v48, %v1919_v50  ;;  %v2377_v19 = vpop.f32.mrb[51].mxu0  ;;  %v1923_v55 = vadd.f32 %v1917_v52, %v2879_v37  ;;  %v1929_v37 = vld [vmem:[%s2050_s28 + $0x10] sm:$0xff] }
0x161f   :  { %v1967_v43 = vpack.c.bf16 %v1930_v3, %v1929_v37 }
0x1620   :  { %v1924_v53 = vadd.f32 %v1920_v4, %v2882_v40  ;;  %v1927_v40 = vld [vmem:[%s2050_s28] sm:$0xff] }
0x1621   :  { %v1966_v62 = vpack.c.bf16 %v1928_v1, %v1927_v40 }
0x1622   :  { %v1933_v56 = vrot.slane %v1924_v53, 7 }
0x1623   :  { %2379 = vmatpush3.bf16.msra.mxu1 %v1966_v62 }
0x1624   :  { %v1936_v57 = vsel %vm1935_vm6, %v1923_v55, %v1933_v56  ;;  %2380 = vmatprep.subr.bf16.mxu1 %v2521_v15 }
0x1625   :  { %v1938_v58 = vsel %vm1937_vm7, %v1936_v57, 0.0 }
0x1626   :  { %1939 = vadd.xlane.f32.xlu0 %v1938_v58 }
0x1627   :  { %2381 = vmatpush3.bf16.msra.mxu1 %v1967_v43 }
0x16b3   :  { %v1940_v59 = vpop.xlane.xlu0 %1939 }
0x16b4   :  { %v1941_v60 = vmul.f32 0.03125, %v1940_v59 }
0x16b6   :  { %v1942_v0 = vsub.f32 %v1936_v57, %v1941_v60 }
0x16b8   :  { %v1943_v39 = vmul.f32 %v1942_v0, %v1942_v0 }
0x16ba   :  { %v1944_v61 = vsel %vm1937_vm7, %v1943_v39, 0.0 }
0x16bb   :  { %1945 = vadd.xlane.f32.xlu1 %v1944_v61 }
0x1748   :  { %v1946_v42 = vpop.xlane.xlu1 %1945 }
0x1749   :  { %v1947_v5 = vmul.f32 0.03125, %v1946_v42 }
0x174b   :  { %v1948_v6 = vadd.f32 1e-05, %v1947_v5 }
0x174d   :  { %2518 = vrsqrt.f32 %v1948_v6 }
0x1757   :  { %v2519_v15 = vpop.eup %2518 }
0x1758   :  { %v1950_v8 = vmul.f32 %v2519_v15, %v1942_v0 }
0x175a   :  { %v1957_v51 = vmul.f32 %v2119_v7, %v1950_v8 }
0x175c   :  { %v1964_v10 = vadd.f32 %v2120_v9, %v1957_v51 }
0x175e   :  { %v1965_v11 = vpack.c.bf16 %v1964_v10, %v1964_v10 }
0x1760   :  { %2383 = vmatmul.mubr.msk.bf16.vlgmr.msra.gmra.mrb[44].mxu1 %vm174_vm0, %v1965_v11 }
0x1833   :  { %v2011_v13 = vpop.f32.mrb[44].mxu1 }
0x1834   :  { %v2012_v14 = vadd.f32 %v2121_v54, %v2011_v13  ;;  %v2384_v16 = vpop.f32.mrb[45].mxu1 }
0x1835   :  { %v2014_v17 = vpop.f32.mrb[46].mxu1 }
0x1836   :  { %2018 = vst.msk [vmem:[%s2052_s17] sm:$0x3] %vm2017_vm8, %v2012_v14  ;;  %v2385_v18 = vpop.f32.mrb[47].mxu1 }

</bundles_post_ra>
